<compile_context>
chip_gen: v6e
topology: v6e:2x2x1
jax: 0.10.0
libtpu: 0.0.40
codegen_flags: <defaults>
</compile_context>

<pallas_src>
import numpy as np
import jax
import jax.numpy as jnp
from jax.experimental import pallas as pl
from jax.experimental.pallas import tpu as pltpu

NUM_HEADS = 8  # fixed by the PyTorch module (nhead=8)


def _layer_norm(x, gamma, beta, eps=1e-5):
    mu = jnp.mean(x, axis=-1, keepdims=True)
    var = jnp.mean((x - mu) ** 2, axis=-1, keepdims=True)
    return (x - mu) * jax.lax.rsqrt(var + eps) * gamma + beta


def _make_kernel(bb, S, T, D, num_heads, head_dim):
    """Kernel processing a block of `bb` batch elements per grid step."""

    def kernel(x_ref, kb_ref, im_ref, om_ref, pe_ref,
               wp_ref,
               wqkv_ref, bqkv_ref,
               wo_ref, bo_ref,
               g1_ref, be1_ref,
               w1_ref, bf1_ref, w2_ref, bf2_ref,
               g2_ref, be2_ref,
               wl_ref, bl_ref,
               out_ref):
        f32 = jnp.float32
        x2 = x_ref[...]                                    # (bb*S, F), batch fused into M

        # --- patch embedding (patch_size=1 -> pointwise linear); bias+PE pre-added ---
        h2 = jnp.dot(x2, wp_ref[...], preferred_element_type=f32) + pe_ref[...]  # (bb*S, D)

        # --- fused QKV projection: one MXU matmul instead of three ---
        qkv = jnp.dot(h2, wqkv_ref[...], preferred_element_type=f32) + bqkv_ref[...]
        q3 = qkv[:, 0 * D:1 * D].reshape(bb, S, D)         # scale already folded into Wq
        k3 = qkv[:, 1 * D:2 * D].reshape(bb, S, D)
        v3 = qkv[:, 2 * D:3 * D].reshape(bb, S, D)

        key_bias = kb_ref[...]                             # (bb, 1, S): -1e9 on padded keys

        # --- multi-head self attention; output projection folded into the head loop
        #     (no lane-axis concat); scores/context are batched 3-D dot_generals. ---
        acc2 = jnp.zeros((bb * S, D), f32)
        for h in range(num_heads):                         # static unroll (num_heads=8)
            lo = h * head_dim
            qh = q3[:, :, lo:lo + head_dim]                # (bb, S, hd)
            kh = k3[:, :, lo:lo + head_dim]
            vh = v3[:, :, lo:lo + head_dim]
            s = jnp.einsum('bqd,bkd->bqk', qh, kh,
                           preferred_element_type=f32) + key_bias   # (bb, S, S)
            s = s - jnp.max(s, axis=-1, keepdims=True)
            p = jnp.exp(s)
            p = p * pl.reciprocal(jnp.sum(p, axis=-1, keepdims=True), approx=True)
            ctx = jnp.einsum('bqk,bkd->bqd', p, vh,
                             preferred_element_type=f32)   # (bb, S, hd)
            acc2 = acc2 + jnp.dot(ctx.reshape(bb * S, head_dim), wo_ref[h],
                                  preferred_element_type=f32)        # (bb*S, D)
        attn2 = acc2 + bo_ref[...]

        # --- post-norm TransformerEncoderLayer (dropout = identity in eval) ---
        y2 = _layer_norm(h2 + attn2, g1_ref[...], be1_ref[...])
        ff = jnp.maximum(
            jnp.dot(y2, w1_ref[...], preferred_element_type=f32) + bf1_ref[...], 0.0)
        ff = jnp.dot(ff, w2_ref[...], preferred_element_type=f32) + bf2_ref[...]
        z2 = _layer_norm(y2 + ff, g2_ref[...], be2_ref[...])

        # --- input mask, output projection, slice to target_len, output mask ---
        enc2 = z2 * im_ref[...]                                        # (bb*S, D)
        out2 = jnp.dot(enc2, wl_ref[...], preferred_element_type=f32) + bl_ref[...]
        out_ref[...] = out2.reshape(bb, S, -1)[:, :T, :] * om_ref[...]  # (bb, T, F)

    return kernel


def transformer_forward(x, input_mask, output_mask, params,
                        num_heads=NUM_HEADS, batch_block=None):
    B, S, F = x.shape
    T = output_mask.shape[1]
    D = params['wp'].shape[1]
    head_dim = D // num_heads
    scale = 1.0 / float(np.sqrt(head_dim))

    # batch_block=B (default) collapses the grid to one step (v5e/v6e);
    # batch_block=ceil(B/2) keeps 2 parallel steps for v7x's two TensorCores.
    bb = B if batch_block is None else batch_block
    assert B % bb == 0, "batch_block must divide batch size"
    nblk = B // bb

    # --- host-side repacks (free layout plumbing, no in-kernel transposes) ---
    x2 = x.reshape(B * S, F)
    im2 = input_mask.astype(jnp.float32).reshape(B * S, 1)
    om = output_mask.astype(jnp.float32).reshape(B, T, 1)
    kb = ((1.0 - input_mask.astype(jnp.float32)) * (-1e9)).reshape(B, 1, S)
    pe2 = jnp.tile(params['pe'] + params['bp'], (B, 1))                   # (B*S, D)

    # fused QKV weight; attention scale folded into the Q block
    wqkv = jnp.concatenate(
        [params['wq'] * scale, params['wk'], params['wv']], axis=1)       # (D, 3D)
    bqkv = jnp.concatenate(
        [params['bq'] * scale, params['bk'], params['bv']], axis=1)       # (1, 3D)
    wo_r = params['wo'].reshape(num_heads, head_dim, D)                   # (H, hd, D)

    weights = [params['wp'], wqkv, bqkv, wo_r, params['bo'],
               params['g1'], params['be1'], params['w1'], params['bf1'],
               params['w2'], params['bf2'], params['g2'], params['be2'],
               params['wl'], params['bl']]

    def full_spec(a):
        nd = a.ndim
        return pl.BlockSpec(a.shape, lambda i, _n=nd: (0,) * _n)

    in_specs = [
        pl.BlockSpec((bb * S, F), lambda i: (i, 0)),     # x, batch fused into rows
        pl.BlockSpec((bb, 1, S), lambda i: (i, 0, 0)),   # key-padding bias
        pl.BlockSpec((bb * S, 1), lambda i: (i, 0)),     # input mask
        pl.BlockSpec((bb, T, 1), lambda i: (i, 0, 0)),   # output mask
        pl.BlockSpec((bb * S, D), lambda i: (i, 0)),     # positional encoding + bp (tiled)
    ] + [full_spec(a) for a in weights]                  # weights: whole array resident

    kernel = _make_kernel(bb, S, T, D, num_heads, head_dim)

    return pl.pallas_call(
        kernel,
        out_shape=jax.ShapeDtypeStruct((B, T, F), jnp.float32),
        grid=(nblk,),
        in_specs=in_specs,
        out_specs=pl.BlockSpec((bb, T, F), lambda i: (i, 0, 0)),
        compiler_params=pltpu.CompilerParams(dimension_semantics=("parallel",)),
    )(x2, kb, im2, om, pe2, *weights)


def reference_forward(x, input_mask, output_mask, params, num_heads=NUM_HEADS):
    """Pure-JAX reference with identical math (for validation)."""
    B, S, F = x.shape
    T = output_mask.shape[1]
    D = params['wp'].shape[1]
    hd = D // num_heads
    im = input_mask.astype(jnp.float32)
    om = output_mask.astype(jnp.float32)

    h = x @ params['wp'] + params['bp'] + params['pe'][None]
    q = h @ params['wq'] + params['bq']
    k = h @ params['wk'] + params['bk']
    v = h @ params['wv'] + params['bv']
    qh = q.reshape(B, S, num_heads, hd).transpose(0, 2, 1, 3)
    kh = k.reshape(B, S, num_heads, hd).transpose(0, 2, 1, 3)
    vh = v.reshape(B, S, num_heads, hd).transpose(0, 2, 1, 3)
    s = jnp.einsum('bhqd,bhkd->bhqk', qh, kh) / np.sqrt(hd)
    s = s + ((1.0 - im) * (-1e9))[:, None, None, :]
    s = s - jnp.max(s, axis=-1, keepdims=True)
    p = jnp.exp(s)
    p = p / jnp.sum(p, axis=-1, keepdims=True)
    attn = jnp.einsum('bhqk,bhkd->bhqd', p, vh).transpose(0, 2, 1, 3).reshape(B, S, D)
    attn = attn @ params['wo'] + params['bo']
    y = _layer_norm(h + attn, params['g1'], params['be1'])
    ff = jnp.maximum(y @ params['w1'] + params['bf1'], 0.0) @ params['w2'] + params['bf2']
    z = _layer_norm(y + ff, params['g2'], params['be2'])
    enc = z * im[..., None]
    out = (enc @ params['wl'] + params['bl'])[:, :T, :] * om[..., None]
    return out


def init_params(key, F, D, S):
    ks = jax.random.split(key, 8)

    def w(k, fan_in, shape):
        return jax.random.normal(k, shape, jnp.float32) / np.sqrt(fan_in)

    # sinusoidal positional encoding table for the first S positions
    pos = np.arange(S)[:, None].astype(np.float32)
    div = np.exp(np.arange(0, D, 2).astype(np.float32) * (-np.log(10000.0) / D))
    pe = np.zeros((S, D), np.float32)
    pe[:, 0::2] = np.sin(pos * div)
    pe[:, 1::2] = np.cos(pos * div)

    return dict(
        pe=jnp.asarray(pe),
        wp=w(ks[0], F, (F, D)), bp=jnp.zeros((1, D), jnp.float32),
        wq=w(ks[1], D, (D, D)), bq=0.01 * jnp.ones((1, D), jnp.float32),
        wk=w(ks[2], D, (D, D)), bk=0.01 * jnp.ones((1, D), jnp.float32),
        wv=w(ks[3], D, (D, D)), bv=0.01 * jnp.ones((1, D), jnp.float32),
        wo=w(ks[4], D, (D, D)), bo=jnp.zeros((1, D), jnp.float32),
        g1=jnp.ones((1, D), jnp.float32), be1=jnp.zeros((1, D), jnp.float32),
        w1=w(ks[5], D, (D, 2 * D)), bf1=jnp.zeros((1, 2 * D), jnp.float32),
        w2=w(ks[6], 2 * D, (2 * D, D)), bf2=jnp.zeros((1, D), jnp.float32),
        g2=jnp.ones((1, D), jnp.float32), be2=jnp.zeros((1, D), jnp.float32),
        wl=w(ks[7], D, (D, F)), bl=jnp.zeros((1, F), jnp.float32),
    )


if __name__ == "__main__":
    # small shapes consistent with the module: feature_dim=4, hidden_dim=32,
    # nhead=8 (head_dim=4), seq=8, target_len=6, batch=2, num_layers=1
    B, S, T, F, D = 2, 8, 6, 4, 32

    key = jax.random.PRNGKey(0)
    kx, kp = jax.random.split(key)
    x = jax.random.normal(kx, (B, S, F), jnp.float32)
    input_mask = jnp.array(
        [[True] * S, [True] * (S - 2) + [False] * 2], dtype=bool)      # (B, S)
    output_mask = jnp.array(
        [[True] * T, [True] * (T - 1) + [False]], dtype=bool)          # (B, T)

    params = init_params(kp, F, D, S)
    ref = reference_forward(x, input_mask, output_mask, params)

    # default: grid collapsed to a single step (batch fused into M) -- v5e/v6e
    out = transformer_forward(x, input_mask, output_mask, params)
    out = jax.block_until_ready(out)
    assert out.shape == (B, T, F)
    # tolerance accounts for the EUP approximate-reciprocal softmax normalization
    assert np.allclose(np.asarray(out), np.asarray(ref), atol=3e-3, rtol=3e-3)

    # v7x-style: 2 parallel grid steps, one batch element per TensorCore
    out2 = transformer_forward(x, input_mask, output_mask, params, batch_block=1)
    out2 = jax.block_until_ready(out2)
    assert np.allclose(np.asarray(out2), np.asarray(ref), atol=3e-3, rtol=3e-3)

    print("KERNEL_OK")
</pallas_src>

<mosaic_0001>
module attributes {stable_mosaic.version = 11 : i64} {
  func.func @kernel(%arg0: i32, %arg1: memref<16x4xf32, #tpu.memory_space<vmem>>, %arg2: memref<2x1x8xf32, #tpu.memory_space<vmem>>, %arg3: memref<16x1xf32, #tpu.memory_space<vmem>>, %arg4: memref<2x6x1xf32, #tpu.memory_space<vmem>>, %arg5: memref<16x32xf32, #tpu.memory_space<vmem>>, %arg6: memref<4x32xf32, #tpu.memory_space<vmem>>, %arg7: memref<32x96xf32, #tpu.memory_space<vmem>>, %arg8: memref<1x96xf32, #tpu.memory_space<vmem>>, %arg9: memref<8x4x32xf32, #tpu.memory_space<vmem>>, %arg10: memref<1x32xf32, #tpu.memory_space<vmem>>, %arg11: memref<1x32xf32, #tpu.memory_space<vmem>>, %arg12: memref<1x32xf32, #tpu.memory_space<vmem>>, %arg13: memref<32x64xf32, #tpu.memory_space<vmem>>, %arg14: memref<1x64xf32, #tpu.memory_space<vmem>>, %arg15: memref<64x32xf32, #tpu.memory_space<vmem>>, %arg16: memref<1x32xf32, #tpu.memory_space<vmem>>, %arg17: memref<1x32xf32, #tpu.memory_space<vmem>>, %arg18: memref<1x32xf32, #tpu.memory_space<vmem>>, %arg19: memref<32x4xf32, #tpu.memory_space<vmem>>, %arg20: memref<1x4xf32, #tpu.memory_space<vmem>>, %arg21: memref<2x6x4xf32, #tpu.memory_space<vmem>>) attributes {dimension_semantics = [#tpu.dimension_semantics<parallel>], iteration_bounds = array<i64: 1>, scalar_prefetch = 0 : i64, scratch_operands = 0 : i64, tpu.core_type = #tpu.core_type<tc>, window_params = [{transform_indices = @transform_0, window_bounds = array<i64: 16, 4>}, {transform_indices = @transform_1, window_bounds = array<i64: 2, 1, 8>}, {transform_indices = @transform_2, window_bounds = array<i64: 16, 1>}, {transform_indices = @transform_3, window_bounds = array<i64: 2, 6, 1>}, {transform_indices = @transform_4, window_bounds = array<i64: 16, 32>}, {pipeline_mode = #tpu.pipeline_mode<synchronous>, transform_indices = @transform_5, window_bounds = array<i64: 4, 32>}, {pipeline_mode = #tpu.pipeline_mode<synchronous>, transform_indices = @transform_6, window_bounds = array<i64: 32, 96>}, {pipeline_mode = #tpu.pipeline_mode<synchronous>, transform_indices = @transform_7, window_bounds = array<i64: 1, 96>}, {pipeline_mode = #tpu.pipeline_mode<synchronous>, transform_indices = @transform_8, window_bounds = array<i64: 8, 4, 32>}, {pipeline_mode = #tpu.pipeline_mode<synchronous>, transform_indices = @transform_9, window_bounds = array<i64: 1, 32>}, {pipeline_mode = #tpu.pipeline_mode<synchronous>, transform_indices = @transform_10, window_bounds = array<i64: 1, 32>}, {pipeline_mode = #tpu.pipeline_mode<synchronous>, transform_indices = @transform_11, window_bounds = array<i64: 1, 32>}, {pipeline_mode = #tpu.pipeline_mode<synchronous>, transform_indices = @transform_12, window_bounds = array<i64: 32, 64>}, {pipeline_mode = #tpu.pipeline_mode<synchronous>, transform_indices = @transform_13, window_bounds = array<i64: 1, 64>}, {pipeline_mode = #tpu.pipeline_mode<synchronous>, transform_indices = @transform_14, window_bounds = array<i64: 64, 32>}, {pipeline_mode = #tpu.pipeline_mode<synchronous>, transform_indices = @transform_15, window_bounds = array<i64: 1, 32>}, {pipeline_mode = #tpu.pipeline_mode<synchronous>, transform_indices = @transform_16, window_bounds = array<i64: 1, 32>}, {pipeline_mode = #tpu.pipeline_mode<synchronous>, transform_indices = @transform_17, window_bounds = array<i64: 1, 32>}, {pipeline_mode = #tpu.pipeline_mode<synchronous>, transform_indices = @transform_18, window_bounds = array<i64: 32, 4>}, {pipeline_mode = #tpu.pipeline_mode<synchronous>, transform_indices = @transform_19, window_bounds = array<i64: 1, 4>}, {transform_indices = @transform_20, window_bounds = array<i64: 2, 6, 4>}]} {
    %c0 = arith.constant 0 : index
    %c0_0 = arith.constant 0 : index
    %0 = vector.load %arg1[%c0, %c0_0] : memref<16x4xf32, #tpu.memory_space<vmem>>, vector<16x4xf32>
    %c0_1 = arith.constant 0 : index
    %c0_2 = arith.constant 0 : index
    %1 = vector.load %arg6[%c0_1, %c0_2] : memref<4x32xf32, #tpu.memory_space<vmem>>, vector<4x32xf32>
    %cst = arith.constant dense<0.000000e+00> : vector<16x32xf32>
    %2 = tpu.matmul %0, %1, %cst {dimension_numbers = #tpu.dot_dimension_numbers<[1], [0], [0], [1], [0, 0, 1, 1], [], []>} : vector<16x4xf32>, vector<4x32xf32>, vector<16x32xf32> -> vector<16x32xf32>
    %c0_3 = arith.constant 0 : index
    %c0_4 = arith.constant 0 : index
    %3 = vector.load %arg5[%c0_3, %c0_4] : memref<16x32xf32, #tpu.memory_space<vmem>>, vector<16x32xf32>
    %4 = arith.addf %2, %3 : vector<16x32xf32>
    %c0_5 = arith.constant 0 : index
    %c0_6 = arith.constant 0 : index
    %5 = vector.load %arg7[%c0_5, %c0_6] : memref<32x96xf32, #tpu.memory_space<vmem>>, vector<32x96xf32>
    %cst_7 = arith.constant dense<0.000000e+00> : vector<16x96xf32>
    %6 = tpu.matmul %4, %5, %cst_7 {dimension_numbers = #tpu.dot_dimension_numbers<[1], [0], [0], [1], [0, 0, 1, 1], [], []>} : vector<16x32xf32>, vector<32x96xf32>, vector<16x96xf32> -> vector<16x96xf32>
    %c0_8 = arith.constant 0 : index
    %c0_9 = arith.constant 0 : index
    %7 = vector.load %arg8[%c0_8, %c0_9] : memref<1x96xf32, #tpu.memory_space<vmem>>, vector<1x96xf32>
    %8 = vector.broadcast %7 : vector<1x96xf32> to vector<16x96xf32>
    %9 = arith.addf %6, %8 : vector<16x96xf32>
    %10 = vector.extract_strided_slice %9 {offsets = [0, 0], sizes = [16, 32], strides = [1, 1]} : vector<16x96xf32> to vector<16x32xf32>
    %11 = vector.shape_cast %10 : vector<16x32xf32> to vector<2x8x32xf32>
    %12 = vector.extract_strided_slice %9 {offsets = [0, 32], sizes = [16, 32], strides = [1, 1]} : vector<16x96xf32> to vector<16x32xf32>
    %13 = vector.shape_cast %12 : vector<16x32xf32> to vector<2x8x32xf32>
    %14 = vector.extract_strided_slice %9 {offsets = [0, 64], sizes = [16, 32], strides = [1, 1]} : vector<16x96xf32> to vector<16x32xf32>
    %15 = vector.shape_cast %14 : vector<16x32xf32> to vector<2x8x32xf32>
    %c0_10 = arith.constant 0 : index
    %c0_11 = arith.constant 0 : index
    %c0_12 = arith.constant 0 : index
    %16 = vector.load %arg2[%c0_10, %c0_11, %c0_12] : memref<2x1x8xf32, #tpu.memory_space<vmem>>, vector<2x1x8xf32>
    %cst_13 = arith.constant 0.000000e+00 : f32
    %17 = vector.broadcast %cst_13 : f32 to vector<16x32xf32>
    %18 = vector.extract_strided_slice %11 {offsets = [0, 0, 0], sizes = [2, 8, 4], strides = [1, 1, 1]} : vector<2x8x32xf32> to vector<2x8x4xf32>
    %19 = vector.extract_strided_slice %13 {offsets = [0, 0, 0], sizes = [2, 8, 4], strides = [1, 1, 1]} : vector<2x8x32xf32> to vector<2x8x4xf32>
    %20 = vector.extract_strided_slice %15 {offsets = [0, 0, 0], sizes = [2, 8, 4], strides = [1, 1, 1]} : vector<2x8x32xf32> to vector<2x8x4xf32>
    "tpu.trace_start"() <{level = 10 : i32, message = "bqd,bkd->bqk"}> : () -> ()
    %cst_14 = arith.constant dense<0.000000e+00> : vector<2x8x8xf32>
    %21 = tpu.matmul %18, %19, %cst_14 {dimension_numbers = #tpu.dot_dimension_numbers<[2], [2], [1], [1], [0, 0, 0, 1, 1, 1], [0], [0]>} : vector<2x8x4xf32>, vector<2x8x4xf32>, vector<2x8x8xf32> -> vector<2x8x8xf32>
    "tpu.trace_stop"() : () -> ()
    %22 = vector.broadcast %16 : vector<2x1x8xf32> to vector<2x8x8xf32>
    %23 = arith.addf %21, %22 : vector<2x8x8xf32>
    %cst_15 = arith.constant dense<0xFF800000> : vector<2x8xf32>
    %24 = vector.multi_reduction <maximumf>, %23, %cst_15 [2] : vector<2x8x8xf32> to vector<2x8xf32>
    %25 = vector.shape_cast %24 : vector<2x8xf32> to vector<2x8x1xf32>
    %26 = vector.broadcast %25 : vector<2x8x1xf32> to vector<2x8x8xf32>
    %27 = arith.subf %23, %26 : vector<2x8x8xf32>
    %28 = math.exp %27 : vector<2x8x8xf32>
    %cst_16 = arith.constant dense<0.000000e+00> : vector<2x8xf32>
    %29 = vector.multi_reduction <add>, %28, %cst_16 [2] : vector<2x8x8xf32> to vector<2x8xf32>
    %30 = vector.shape_cast %29 : vector<2x8xf32> to vector<2x8x1xf32>
    %31 = tpu.reciprocal %30 {approx = true} : vector<2x8x1xf32> -> vector<2x8x1xf32>
    %32 = vector.broadcast %31 : vector<2x8x1xf32> to vector<2x8x8xf32>
    %33 = arith.mulf %28, %32 : vector<2x8x8xf32>
    "tpu.trace_start"() <{level = 10 : i32, message = "bqk,bkd->bqd"}> : () -> ()
    %cst_17 = arith.constant dense<0.000000e+00> : vector<2x8x4xf32>
    %34 = tpu.matmul %33, %20, %cst_17 {dimension_numbers = #tpu.dot_dimension_numbers<[2], [1], [1], [2], [0, 0, 0, 1, 1, 2], [0], [0]>} : vector<2x8x8xf32>, vector<2x8x4xf32>, vector<2x8x4xf32> -> vector<2x8x4xf32>
    "tpu.trace_stop"() : () -> ()
    %35 = vector.shape_cast %34 : vector<2x8x4xf32> to vector<16x4xf32>
    %c0_18 = arith.constant 0 : index
    %c0_19 = arith.constant 0 : index
    %c0_20 = arith.constant 0 : index
    %36 = vector.load %arg9[%c0_18, %c0_19, %c0_20] : memref<8x4x32xf32, #tpu.memory_space<vmem>>, vector<1x4x32xf32>
    %37 = vector.shape_cast %36 : vector<1x4x32xf32> to vector<4x32xf32>
    %cst_21 = arith.constant dense<0.000000e+00> : vector<16x32xf32>
    %38 = tpu.matmul %35, %37, %cst_21 {dimension_numbers = #tpu.dot_dimension_numbers<[1], [0], [0], [1], [0, 0, 1, 1], [], []>} : vector<16x4xf32>, vector<4x32xf32>, vector<16x32xf32> -> vector<16x32xf32>
    %39 = arith.addf %17, %38 : vector<16x32xf32>
    %40 = vector.extract_strided_slice %11 {offsets = [0, 0, 4], sizes = [2, 8, 4], strides = [1, 1, 1]} : vector<2x8x32xf32> to vector<2x8x4xf32>
    %41 = vector.extract_strided_slice %13 {offsets = [0, 0, 4], sizes = [2, 8, 4], strides = [1, 1, 1]} : vector<2x8x32xf32> to vector<2x8x4xf32>
    %42 = vector.extract_strided_slice %15 {offsets = [0, 0, 4], sizes = [2, 8, 4], strides = [1, 1, 1]} : vector<2x8x32xf32> to vector<2x8x4xf32>
    "tpu.trace_start"() <{level = 10 : i32, message = "bqd,bkd->bqk"}> : () -> ()
    %cst_22 = arith.constant dense<0.000000e+00> : vector<2x8x8xf32>
    %43 = tpu.matmul %40, %41, %cst_22 {dimension_numbers = #tpu.dot_dimension_numbers<[2], [2], [1], [1], [0, 0, 0, 1, 1, 1], [0], [0]>} : vector<2x8x4xf32>, vector<2x8x4xf32>, vector<2x8x8xf32> -> vector<2x8x8xf32>
    "tpu.trace_stop"() : () -> ()
    %44 = vector.broadcast %16 : vector<2x1x8xf32> to vector<2x8x8xf32>
    %45 = arith.addf %43, %44 : vector<2x8x8xf32>
    %cst_23 = arith.constant dense<0xFF800000> : vector<2x8xf32>
    %46 = vector.multi_reduction <maximumf>, %45, %cst_23 [2] : vector<2x8x8xf32> to vector<2x8xf32>
    %47 = vector.shape_cast %46 : vector<2x8xf32> to vector<2x8x1xf32>
    %48 = vector.broadcast %47 : vector<2x8x1xf32> to vector<2x8x8xf32>
    %49 = arith.subf %45, %48 : vector<2x8x8xf32>
    %50 = math.exp %49 : vector<2x8x8xf32>
    %cst_24 = arith.constant dense<0.000000e+00> : vector<2x8xf32>
    %51 = vector.multi_reduction <add>, %50, %cst_24 [2] : vector<2x8x8xf32> to vector<2x8xf32>
    %52 = vector.shape_cast %51 : vector<2x8xf32> to vector<2x8x1xf32>
    %53 = tpu.reciprocal %52 {approx = true} : vector<2x8x1xf32> -> vector<2x8x1xf32>
    %54 = vector.broadcast %53 : vector<2x8x1xf32> to vector<2x8x8xf32>
    %55 = arith.mulf %50, %54 : vector<2x8x8xf32>
    "tpu.trace_start"() <{level = 10 : i32, message = "bqk,bkd->bqd"}> : () -> ()
    %cst_25 = arith.constant dense<0.000000e+00> : vector<2x8x4xf32>
    %56 = tpu.matmul %55, %42, %cst_25 {dimension_numbers = #tpu.dot_dimension_numbers<[2], [1], [1], [2], [0, 0, 0, 1, 1, 2], [0], [0]>} : vector<2x8x8xf32>, vector<2x8x4xf32>, vector<2x8x4xf32> -> vector<2x8x4xf32>
    "tpu.trace_stop"() : () -> ()
    %57 = vector.shape_cast %56 : vector<2x8x4xf32> to vector<16x4xf32>
    %c1 = arith.constant 1 : index
    %c0_26 = arith.constant 0 : index
    %c0_27 = arith.constant 0 : index
    %58 = vector.load %arg9[%c1, %c0_26, %c0_27] : memref<8x4x32xf32, #tpu.memory_space<vmem>>, vector<1x4x32xf32>
    %59 = vector.shape_cast %58 : vector<1x4x32xf32> to vector<4x32xf32>
    %cst_28 = arith.constant dense<0.000000e+00> : vector<16x32xf32>
    %60 = tpu.matmul %57, %59, %cst_28 {dimension_numbers = #tpu.dot_dimension_numbers<[1], [0], [0], [1], [0, 0, 1, 1], [], []>} : vector<16x4xf32>, vector<4x32xf32>, vector<16x32xf32> -> vector<16x32xf32>
    %61 = arith.addf %39, %60 : vector<16x32xf32>
    %62 = vector.extract_strided_slice %11 {offsets = [0, 0, 8], sizes = [2, 8, 4], strides = [1, 1, 1]} : vector<2x8x32xf32> to vector<2x8x4xf32>
    %63 = vector.extract_strided_slice %13 {offsets = [0, 0, 8], sizes = [2, 8, 4], strides = [1, 1, 1]} : vector<2x8x32xf32> to vector<2x8x4xf32>
    %64 = vector.extract_strided_slice %15 {offsets = [0, 0, 8], sizes = [2, 8, 4], strides = [1, 1, 1]} : vector<2x8x32xf32> to vector<2x8x4xf32>
    "tpu.trace_start"() <{level = 10 : i32, message = "bqd,bkd->bqk"}> : () -> ()
    %cst_29 = arith.constant dense<0.000000e+00> : vector<2x8x8xf32>
    %65 = tpu.matmul %62, %63, %cst_29 {dimension_numbers = #tpu.dot_dimension_numbers<[2], [2], [1], [1], [0, 0, 0, 1, 1, 1], [0], [0]>} : vector<2x8x4xf32>, vector<2x8x4xf32>, vector<2x8x8xf32> -> vector<2x8x8xf32>
    "tpu.trace_stop"() : () -> ()
    %66 = vector.broadcast %16 : vector<2x1x8xf32> to vector<2x8x8xf32>
    %67 = arith.addf %65, %66 : vector<2x8x8xf32>
    %cst_30 = arith.constant dense<0xFF800000> : vector<2x8xf32>
    %68 = vector.multi_reduction <maximumf>, %67, %cst_30 [2] : vector<2x8x8xf32> to vector<2x8xf32>
    %69 = vector.shape_cast %68 : vector<2x8xf32> to vector<2x8x1xf32>
    %70 = vector.broadcast %69 : vector<2x8x1xf32> to vector<2x8x8xf32>
    %71 = arith.subf %67, %70 : vector<2x8x8xf32>
    %72 = math.exp %71 : vector<2x8x8xf32>
    %cst_31 = arith.constant dense<0.000000e+00> : vector<2x8xf32>
    %73 = vector.multi_reduction <add>, %72, %cst_31 [2] : vector<2x8x8xf32> to vector<2x8xf32>
    %74 = vector.shape_cast %73 : vector<2x8xf32> to vector<2x8x1xf32>
    %75 = tpu.reciprocal %74 {approx = true} : vector<2x8x1xf32> -> vector<2x8x1xf32>
    %76 = vector.broadcast %75 : vector<2x8x1xf32> to vector<2x8x8xf32>
    %77 = arith.mulf %72, %76 : vector<2x8x8xf32>
    "tpu.trace_start"() <{level = 10 : i32, message = "bqk,bkd->bqd"}> : () -> ()
    %cst_32 = arith.constant dense<0.000000e+00> : vector<2x8x4xf32>
    %78 = tpu.matmul %77, %64, %cst_32 {dimension_numbers = #tpu.dot_dimension_numbers<[2], [1], [1], [2], [0, 0, 0, 1, 1, 2], [0], [0]>} : vector<2x8x8xf32>, vector<2x8x4xf32>, vector<2x8x4xf32> -> vector<2x8x4xf32>
    "tpu.trace_stop"() : () -> ()
    %79 = vector.shape_cast %78 : vector<2x8x4xf32> to vector<16x4xf32>
    %c2 = arith.constant 2 : index
    %c0_33 = arith.constant 0 : index
    %c0_34 = arith.constant 0 : index
    %80 = vector.load %arg9[%c2, %c0_33, %c0_34] : memref<8x4x32xf32, #tpu.memory_space<vmem>>, vector<1x4x32xf32>
    %81 = vector.shape_cast %80 : vector<1x4x32xf32> to vector<4x32xf32>
    %cst_35 = arith.constant dense<0.000000e+00> : vector<16x32xf32>
    %82 = tpu.matmul %79, %81, %cst_35 {dimension_numbers = #tpu.dot_dimension_numbers<[1], [0], [0], [1], [0, 0, 1, 1], [], []>} : vector<16x4xf32>, vector<4x32xf32>, vector<16x32xf32> -> vector<16x32xf32>
    %83 = arith.addf %61, %82 : vector<16x32xf32>
    %84 = vector.extract_strided_slice %11 {offsets = [0, 0, 12], sizes = [2, 8, 4], strides = [1, 1, 1]} : vector<2x8x32xf32> to vector<2x8x4xf32>
    %85 = vector.extract_strided_slice %13 {offsets = [0, 0, 12], sizes = [2, 8, 4], strides = [1, 1, 1]} : vector<2x8x32xf32> to vector<2x8x4xf32>
    %86 = vector.extract_strided_slice %15 {offsets = [0, 0, 12], sizes = [2, 8, 4], strides = [1, 1, 1]} : vector<2x8x32xf32> to vector<2x8x4xf32>
    "tpu.trace_start"() <{level = 10 : i32, message = "bqd,bkd->bqk"}> : () -> ()
    %cst_36 = arith.constant dense<0.000000e+00> : vector<2x8x8xf32>
    %87 = tpu.matmul %84, %85, %cst_36 {dimension_numbers = #tpu.dot_dimension_numbers<[2], [2], [1], [1], [0, 0, 0, 1, 1, 1], [0], [0]>} : vector<2x8x4xf32>, vector<2x8x4xf32>, vector<2x8x8xf32> -> vector<2x8x8xf32>
    "tpu.trace_stop"() : () -> ()
    %88 = vector.broadcast %16 : vector<2x1x8xf32> to vector<2x8x8xf32>
    %89 = arith.addf %87, %88 : vector<2x8x8xf32>
    %cst_37 = arith.constant dense<0xFF800000> : vector<2x8xf32>
    %90 = vector.multi_reduction <maximumf>, %89, %cst_37 [2] : vector<2x8x8xf32> to vector<2x8xf32>
    %91 = vector.shape_cast %90 : vector<2x8xf32> to vector<2x8x1xf32>
    %92 = vector.broadcast %91 : vector<2x8x1xf32> to vector<2x8x8xf32>
    %93 = arith.subf %89, %92 : vector<2x8x8xf32>
    %94 = math.exp %93 : vector<2x8x8xf32>
    %cst_38 = arith.constant dense<0.000000e+00> : vector<2x8xf32>
    %95 = vector.multi_reduction <add>, %94, %cst_38 [2] : vector<2x8x8xf32> to vector<2x8xf32>
    %96 = vector.shape_cast %95 : vector<2x8xf32> to vector<2x8x1xf32>
    %97 = tpu.reciprocal %96 {approx = true} : vector<2x8x1xf32> -> vector<2x8x1xf32>
    %98 = vector.broadcast %97 : vector<2x8x1xf32> to vector<2x8x8xf32>
    %99 = arith.mulf %94, %98 : vector<2x8x8xf32>
    "tpu.trace_start"() <{level = 10 : i32, message = "bqk,bkd->bqd"}> : () -> ()
    %cst_39 = arith.constant dense<0.000000e+00> : vector<2x8x4xf32>
    %100 = tpu.matmul %99, %86, %cst_39 {dimension_numbers = #tpu.dot_dimension_numbers<[2], [1], [1], [2], [0, 0, 0, 1, 1, 2], [0], [0]>} : vector<2x8x8xf32>, vector<2x8x4xf32>, vector<2x8x4xf32> -> vector<2x8x4xf32>
    "tpu.trace_stop"() : () -> ()
    %101 = vector.shape_cast %100 : vector<2x8x4xf32> to vector<16x4xf32>
    %c3 = arith.constant 3 : index
    %c0_40 = arith.constant 0 : index
    %c0_41 = arith.constant 0 : index
    %102 = vector.load %arg9[%c3, %c0_40, %c0_41] : memref<8x4x32xf32, #tpu.memory_space<vmem>>, vector<1x4x32xf32>
    %103 = vector.shape_cast %102 : vector<1x4x32xf32> to vector<4x32xf32>
    %cst_42 = arith.constant dense<0.000000e+00> : vector<16x32xf32>
    %104 = tpu.matmul %101, %103, %cst_42 {dimension_numbers = #tpu.dot_dimension_numbers<[1], [0], [0], [1], [0, 0, 1, 1], [], []>} : vector<16x4xf32>, vector<4x32xf32>, vector<16x32xf32> -> vector<16x32xf32>
    %105 = arith.addf %83, %104 : vector<16x32xf32>
    %106 = vector.extract_strided_slice %11 {offsets = [0, 0, 16], sizes = [2, 8, 4], strides = [1, 1, 1]} : vector<2x8x32xf32> to vector<2x8x4xf32>
    %107 = vector.extract_strided_slice %13 {offsets = [0, 0, 16], sizes = [2, 8, 4], strides = [1, 1, 1]} : vector<2x8x32xf32> to vector<2x8x4xf32>
    %108 = vector.extract_strided_slice %15 {offsets = [0, 0, 16], sizes = [2, 8, 4], strides = [1, 1, 1]} : vector<2x8x32xf32> to vector<2x8x4xf32>
    "tpu.trace_start"() <{level = 10 : i32, message = "bqd,bkd->bqk"}> : () -> ()
    %cst_43 = arith.constant dense<0.000000e+00> : vector<2x8x8xf32>
    %109 = tpu.matmul %106, %107, %cst_43 {dimension_numbers = #tpu.dot_dimension_numbers<[2], [2], [1], [1], [0, 0, 0, 1, 1, 1], [0], [0]>} : vector<2x8x4xf32>, vector<2x8x4xf32>, vector<2x8x8xf32> -> vector<2x8x8xf32>
    "tpu.trace_stop"() : () -> ()
    %110 = vector.broadcast %16 : vector<2x1x8xf32> to vector<2x8x8xf32>
    %111 = arith.addf %109, %110 : vector<2x8x8xf32>
    %cst_44 = arith.constant dense<0xFF800000> : vector<2x8xf32>
    %112 = vector.multi_reduction <maximumf>, %111, %cst_44 [2] : vector<2x8x8xf32> to vector<2x8xf32>
    %113 = vector.shape_cast %112 : vector<2x8xf32> to vector<2x8x1xf32>
    %114 = vector.broadcast %113 : vector<2x8x1xf32> to vector<2x8x8xf32>
    %115 = arith.subf %111, %114 : vector<2x8x8xf32>
    %116 = math.exp %115 : vector<2x8x8xf32>
    %cst_45 = arith.constant dense<0.000000e+00> : vector<2x8xf32>
    %117 = vector.multi_reduction <add>, %116, %cst_45 [2] : vector<2x8x8xf32> to vector<2x8xf32>
    %118 = vector.shape_cast %117 : vector<2x8xf32> to vector<2x8x1xf32>
    %119 = tpu.reciprocal %118 {approx = true} : vector<2x8x1xf32> -> vector<2x8x1xf32>
    %120 = vector.broadcast %119 : vector<2x8x1xf32> to vector<2x8x8xf32>
    %121 = arith.mulf %116, %120 : vector<2x8x8xf32>
    "tpu.trace_start"() <{level = 10 : i32, message = "bqk,bkd->bqd"}> : () -> ()
    %cst_46 = arith.constant dense<0.000000e+00> : vector<2x8x4xf32>
    %122 = tpu.matmul %121, %108, %cst_46 {dimension_numbers = #tpu.dot_dimension_numbers<[2], [1], [1], [2], [0, 0, 0, 1, 1, 2], [0], [0]>} : vector<2x8x8xf32>, vector<2x8x4xf32>, vector<2x8x4xf32> -> vector<2x8x4xf32>
    "tpu.trace_stop"() : () -> ()
    %123 = vector.shape_cast %122 : vector<2x8x4xf32> to vector<16x4xf32>
    %c4 = arith.constant 4 : index
    %c0_47 = arith.constant 0 : index
    %c0_48 = arith.constant 0 : index
    %124 = vector.load %arg9[%c4, %c0_47, %c0_48] : memref<8x4x32xf32, #tpu.memory_space<vmem>>, vector<1x4x32xf32>
    %125 = vector.shape_cast %124 : vector<1x4x32xf32> to vector<4x32xf32>
    %cst_49 = arith.constant dense<0.000000e+00> : vector<16x32xf32>
    %126 = tpu.matmul %123, %125, %cst_49 {dimension_numbers = #tpu.dot_dimension_numbers<[1], [0], [0], [1], [0, 0, 1, 1], [], []>} : vector<16x4xf32>, vector<4x32xf32>, vector<16x32xf32> -> vector<16x32xf32>
    %127 = arith.addf %105, %126 : vector<16x32xf32>
    %128 = vector.extract_strided_slice %11 {offsets = [0, 0, 20], sizes = [2, 8, 4], strides = [1, 1, 1]} : vector<2x8x32xf32> to vector<2x8x4xf32>
    %129 = vector.extract_strided_slice %13 {offsets = [0, 0, 20], sizes = [2, 8, 4], strides = [1, 1, 1]} : vector<2x8x32xf32> to vector<2x8x4xf32>
    %130 = vector.extract_strided_slice %15 {offsets = [0, 0, 20], sizes = [2, 8, 4], strides = [1, 1, 1]} : vector<2x8x32xf32> to vector<2x8x4xf32>
    "tpu.trace_start"() <{level = 10 : i32, message = "bqd,bkd->bqk"}> : () -> ()
    %cst_50 = arith.constant dense<0.000000e+00> : vector<2x8x8xf32>
    %131 = tpu.matmul %128, %129, %cst_50 {dimension_numbers = #tpu.dot_dimension_numbers<[2], [2], [1], [1], [0, 0, 0, 1, 1, 1], [0], [0]>} : vector<2x8x4xf32>, vector<2x8x4xf32>, vector<2x8x8xf32> -> vector<2x8x8xf32>
    "tpu.trace_stop"() : () -> ()
    %132 = vector.broadcast %16 : vector<2x1x8xf32> to vector<2x8x8xf32>
    %133 = arith.addf %131, %132 : vector<2x8x8xf32>
    %cst_51 = arith.constant dense<0xFF800000> : vector<2x8xf32>
    %134 = vector.multi_reduction <maximumf>, %133, %cst_51 [2] : vector<2x8x8xf32> to vector<2x8xf32>
    %135 = vector.shape_cast %134 : vector<2x8xf32> to vector<2x8x1xf32>
    %136 = vector.broadcast %135 : vector<2x8x1xf32> to vector<2x8x8xf32>
    %137 = arith.subf %133, %136 : vector<2x8x8xf32>
    %138 = math.exp %137 : vector<2x8x8xf32>
    %cst_52 = arith.constant dense<0.000000e+00> : vector<2x8xf32>
    %139 = vector.multi_reduction <add>, %138, %cst_52 [2] : vector<2x8x8xf32> to vector<2x8xf32>
    %140 = vector.shape_cast %139 : vector<2x8xf32> to vector<2x8x1xf32>
    %141 = tpu.reciprocal %140 {approx = true} : vector<2x8x1xf32> -> vector<2x8x1xf32>
    %142 = vector.broadcast %141 : vector<2x8x1xf32> to vector<2x8x8xf32>
    %143 = arith.mulf %138, %142 : vector<2x8x8xf32>
    "tpu.trace_start"() <{level = 10 : i32, message = "bqk,bkd->bqd"}> : () -> ()
    %cst_53 = arith.constant dense<0.000000e+00> : vector<2x8x4xf32>
    %144 = tpu.matmul %143, %130, %cst_53 {dimension_numbers = #tpu.dot_dimension_numbers<[2], [1], [1], [2], [0, 0, 0, 1, 1, 2], [0], [0]>} : vector<2x8x8xf32>, vector<2x8x4xf32>, vector<2x8x4xf32> -> vector<2x8x4xf32>
    "tpu.trace_stop"() : () -> ()
    %145 = vector.shape_cast %144 : vector<2x8x4xf32> to vector<16x4xf32>
    %c5 = arith.constant 5 : index
    %c0_54 = arith.constant 0 : index
    %c0_55 = arith.constant 0 : index
    %146 = vector.load %arg9[%c5, %c0_54, %c0_55] : memref<8x4x32xf32, #tpu.memory_space<vmem>>, vector<1x4x32xf32>
    %147 = vector.shape_cast %146 : vector<1x4x32xf32> to vector<4x32xf32>
    %cst_56 = arith.constant dense<0.000000e+00> : vector<16x32xf32>
    %148 = tpu.matmul %145, %147, %cst_56 {dimension_numbers = #tpu.dot_dimension_numbers<[1], [0], [0], [1], [0, 0, 1, 1], [], []>} : vector<16x4xf32>, vector<4x32xf32>, vector<16x32xf32> -> vector<16x32xf32>
    %149 = arith.addf %127, %148 : vector<16x32xf32>
    %150 = vector.extract_strided_slice %11 {offsets = [0, 0, 24], sizes = [2, 8, 4], strides = [1, 1, 1]} : vector<2x8x32xf32> to vector<2x8x4xf32>
    %151 = vector.extract_strided_slice %13 {offsets = [0, 0, 24], sizes = [2, 8, 4], strides = [1, 1, 1]} : vector<2x8x32xf32> to vector<2x8x4xf32>
    %152 = vector.extract_strided_slice %15 {offsets = [0, 0, 24], sizes = [2, 8, 4], strides = [1, 1, 1]} : vector<2x8x32xf32> to vector<2x8x4xf32>
    "tpu.trace_start"() <{level = 10 : i32, message = "bqd,bkd->bqk"}> : () -> ()
    %cst_57 = arith.constant dense<0.000000e+00> : vector<2x8x8xf32>
    %153 = tpu.matmul %150, %151, %cst_57 {dimension_numbers = #tpu.dot_dimension_numbers<[2], [2], [1], [1], [0, 0, 0, 1, 1, 1], [0], [0]>} : vector<2x8x4xf32>, vector<2x8x4xf32>, vector<2x8x8xf32> -> vector<2x8x8xf32>
    "tpu.trace_stop"() : () -> ()
    %154 = vector.broadcast %16 : vector<2x1x8xf32> to vector<2x8x8xf32>
    %155 = arith.addf %153, %154 : vector<2x8x8xf32>
    %cst_58 = arith.constant dense<0xFF800000> : vector<2x8xf32>
    %156 = vector.multi_reduction <maximumf>, %155, %cst_58 [2] : vector<2x8x8xf32> to vector<2x8xf32>
    %157 = vector.shape_cast %156 : vector<2x8xf32> to vector<2x8x1xf32>
    %158 = vector.broadcast %157 : vector<2x8x1xf32> to vector<2x8x8xf32>
    %159 = arith.subf %155, %158 : vector<2x8x8xf32>
    %160 = math.exp %159 : vector<2x8x8xf32>
    %cst_59 = arith.constant dense<0.000000e+00> : vector<2x8xf32>
    %161 = vector.multi_reduction <add>, %160, %cst_59 [2] : vector<2x8x8xf32> to vector<2x8xf32>
    %162 = vector.shape_cast %161 : vector<2x8xf32> to vector<2x8x1xf32>
    %163 = tpu.reciprocal %162 {approx = true} : vector<2x8x1xf32> -> vector<2x8x1xf32>
    %164 = vector.broadcast %163 : vector<2x8x1xf32> to vector<2x8x8xf32>
    %165 = arith.mulf %160, %164 : vector<2x8x8xf32>
    "tpu.trace_start"() <{level = 10 : i32, message = "bqk,bkd->bqd"}> : () -> ()
    %cst_60 = arith.constant dense<0.000000e+00> : vector<2x8x4xf32>
    %166 = tpu.matmul %165, %152, %cst_60 {dimension_numbers = #tpu.dot_dimension_numbers<[2], [1], [1], [2], [0, 0, 0, 1, 1, 2], [0], [0]>} : vector<2x8x8xf32>, vector<2x8x4xf32>, vector<2x8x4xf32> -> vector<2x8x4xf32>
    "tpu.trace_stop"() : () -> ()
    %167 = vector.shape_cast %166 : vector<2x8x4xf32> to vector<16x4xf32>
    %c6 = arith.constant 6 : index
    %c0_61 = arith.constant 0 : index
    %c0_62 = arith.constant 0 : index
    %168 = vector.load %arg9[%c6, %c0_61, %c0_62] : memref<8x4x32xf32, #tpu.memory_space<vmem>>, vector<1x4x32xf32>
    %169 = vector.shape_cast %168 : vector<1x4x32xf32> to vector<4x32xf32>
    %cst_63 = arith.constant dense<0.000000e+00> : vector<16x32xf32>
    %170 = tpu.matmul %167, %169, %cst_63 {dimension_numbers = #tpu.dot_dimension_numbers<[1], [0], [0], [1], [0, 0, 1, 1], [], []>} : vector<16x4xf32>, vector<4x32xf32>, vector<16x32xf32> -> vector<16x32xf32>
    %171 = arith.addf %149, %170 : vector<16x32xf32>
    %172 = vector.extract_strided_slice %11 {offsets = [0, 0, 28], sizes = [2, 8, 4], strides = [1, 1, 1]} : vector<2x8x32xf32> to vector<2x8x4xf32>
    %173 = vector.extract_strided_slice %13 {offsets = [0, 0, 28], sizes = [2, 8, 4], strides = [1, 1, 1]} : vector<2x8x32xf32> to vector<2x8x4xf32>
    %174 = vector.extract_strided_slice %15 {offsets = [0, 0, 28], sizes = [2, 8, 4], strides = [1, 1, 1]} : vector<2x8x32xf32> to vector<2x8x4xf32>
    "tpu.trace_start"() <{level = 10 : i32, message = "bqd,bkd->bqk"}> : () -> ()
    %cst_64 = arith.constant dense<0.000000e+00> : vector<2x8x8xf32>
    %175 = tpu.matmul %172, %173, %cst_64 {dimension_numbers = #tpu.dot_dimension_numbers<[2], [2], [1], [1], [0, 0, 0, 1, 1, 1], [0], [0]>} : vector<2x8x4xf32>, vector<2x8x4xf32>, vector<2x8x8xf32> -> vector<2x8x8xf32>
    "tpu.trace_stop"() : () -> ()
    %176 = vector.broadcast %16 : vector<2x1x8xf32> to vector<2x8x8xf32>
    %177 = arith.addf %175, %176 : vector<2x8x8xf32>
    %cst_65 = arith.constant dense<0xFF800000> : vector<2x8xf32>
    %178 = vector.multi_reduction <maximumf>, %177, %cst_65 [2] : vector<2x8x8xf32> to vector<2x8xf32>
    %179 = vector.shape_cast %178 : vector<2x8xf32> to vector<2x8x1xf32>
    %180 = vector.broadcast %179 : vector<2x8x1xf32> to vector<2x8x8xf32>
    %181 = arith.subf %177, %180 : vector<2x8x8xf32>
    %182 = math.exp %181 : vector<2x8x8xf32>
    %cst_66 = arith.constant dense<0.000000e+00> : vector<2x8xf32>
    %183 = vector.multi_reduction <add>, %182, %cst_66 [2] : vector<2x8x8xf32> to vector<2x8xf32>
    %184 = vector.shape_cast %183 : vector<2x8xf32> to vector<2x8x1xf32>
    %185 = tpu.reciprocal %184 {approx = true} : vector<2x8x1xf32> -> vector<2x8x1xf32>
    %186 = vector.broadcast %185 : vector<2x8x1xf32> to vector<2x8x8xf32>
    %187 = arith.mulf %182, %186 : vector<2x8x8xf32>
    "tpu.trace_start"() <{level = 10 : i32, message = "bqk,bkd->bqd"}> : () -> ()
    %cst_67 = arith.constant dense<0.000000e+00> : vector<2x8x4xf32>
    %188 = tpu.matmul %187, %174, %cst_67 {dimension_numbers = #tpu.dot_dimension_numbers<[2], [1], [1], [2], [0, 0, 0, 1, 1, 2], [0], [0]>} : vector<2x8x8xf32>, vector<2x8x4xf32>, vector<2x8x4xf32> -> vector<2x8x4xf32>
    "tpu.trace_stop"() : () -> ()
    %189 = vector.shape_cast %188 : vector<2x8x4xf32> to vector<16x4xf32>
    %c7 = arith.constant 7 : index
    %c0_68 = arith.constant 0 : index
    %c0_69 = arith.constant 0 : index
    %190 = vector.load %arg9[%c7, %c0_68, %c0_69] : memref<8x4x32xf32, #tpu.memory_space<vmem>>, vector<1x4x32xf32>
    %191 = vector.shape_cast %190 : vector<1x4x32xf32> to vector<4x32xf32>
    %cst_70 = arith.constant dense<0.000000e+00> : vector<16x32xf32>
    %192 = tpu.matmul %189, %191, %cst_70 {dimension_numbers = #tpu.dot_dimension_numbers<[1], [0], [0], [1], [0, 0, 1, 1], [], []>} : vector<16x4xf32>, vector<4x32xf32>, vector<16x32xf32> -> vector<16x32xf32>
    %193 = arith.addf %171, %192 : vector<16x32xf32>
    %c0_71 = arith.constant 0 : index
    %c0_72 = arith.constant 0 : index
    %194 = vector.load %arg10[%c0_71, %c0_72] : memref<1x32xf32, #tpu.memory_space<vmem>>, vector<1x32xf32>
    %195 = vector.broadcast %194 : vector<1x32xf32> to vector<16x32xf32>
    %196 = arith.addf %193, %195 : vector<16x32xf32>
    %197 = arith.addf %4, %196 : vector<16x32xf32>
    %c0_73 = arith.constant 0 : index
    %c0_74 = arith.constant 0 : index
    %198 = vector.load %arg11[%c0_73, %c0_74] : memref<1x32xf32, #tpu.memory_space<vmem>>, vector<1x32xf32>
    %c0_75 = arith.constant 0 : index
    %c0_76 = arith.constant 0 : index
    %199 = vector.load %arg12[%c0_75, %c0_76] : memref<1x32xf32, #tpu.memory_space<vmem>>, vector<1x32xf32>
    %cst_77 = arith.constant dense<0.000000e+00> : vector<16xf32>
    %200 = vector.multi_reduction <add>, %197, %cst_77 [1] : vector<16x32xf32> to vector<16xf32>
    %201 = vector.shape_cast %200 : vector<16xf32> to vector<16x1xf32>
    %cst_78 = arith.constant 3.200000e+01 : f32
    %202 = vector.broadcast %cst_78 : f32 to vector<16x1xf32>
    %203 = arith.divf %201, %202 : vector<16x1xf32>
    %204 = vector.broadcast %203 : vector<16x1xf32> to vector<16x32xf32>
    %205 = arith.subf %197, %204 : vector<16x32xf32>
    %206 = arith.mulf %205, %205 : vector<16x32xf32>
    %cst_79 = arith.constant dense<0.000000e+00> : vector<16xf32>
    %207 = vector.multi_reduction <add>, %206, %cst_79 [1] : vector<16x32xf32> to vector<16xf32>
    %208 = vector.shape_cast %207 : vector<16xf32> to vector<16x1xf32>
    %cst_80 = arith.constant 3.200000e+01 : f32
    %209 = vector.broadcast %cst_80 : f32 to vector<16x1xf32>
    %210 = arith.divf %208, %209 : vector<16x1xf32>
    %211 = vector.broadcast %203 : vector<16x1xf32> to vector<16x32xf32>
    %212 = arith.subf %197, %211 : vector<16x32xf32>
    %cst_81 = arith.constant 9.99999974E-6 : f32
    %213 = vector.broadcast %cst_81 : f32 to vector<16x1xf32>
    %214 = arith.addf %210, %213 : vector<16x1xf32>
    %215 = math.rsqrt %214 : vector<16x1xf32>
    %216 = vector.broadcast %215 : vector<16x1xf32> to vector<16x32xf32>
    %217 = arith.mulf %212, %216 : vector<16x32xf32>
    %218 = vector.broadcast %198 : vector<1x32xf32> to vector<16x32xf32>
    %219 = arith.mulf %217, %218 : vector<16x32xf32>
    %220 = vector.broadcast %199 : vector<1x32xf32> to vector<16x32xf32>
    %221 = arith.addf %219, %220 : vector<16x32xf32>
    %c0_82 = arith.constant 0 : index
    %c0_83 = arith.constant 0 : index
    %222 = vector.load %arg13[%c0_82, %c0_83] : memref<32x64xf32, #tpu.memory_space<vmem>>, vector<32x64xf32>
    %cst_84 = arith.constant dense<0.000000e+00> : vector<16x64xf32>
    %223 = tpu.matmul %221, %222, %cst_84 {dimension_numbers = #tpu.dot_dimension_numbers<[1], [0], [0], [1], [0, 0, 1, 1], [], []>} : vector<16x32xf32>, vector<32x64xf32>, vector<16x64xf32> -> vector<16x64xf32>
    %c0_85 = arith.constant 0 : index
    %c0_86 = arith.constant 0 : index
    %224 = vector.load %arg14[%c0_85, %c0_86] : memref<1x64xf32, #tpu.memory_space<vmem>>, vector<1x64xf32>
    %225 = vector.broadcast %224 : vector<1x64xf32> to vector<16x64xf32>
    %226 = arith.addf %223, %225 : vector<16x64xf32>
    %cst_87 = arith.constant 0.000000e+00 : f32
    %227 = vector.broadcast %cst_87 : f32 to vector<16x64xf32>
    %228 = arith.maximumf %226, %227 : vector<16x64xf32>
    %c0_88 = arith.constant 0 : index
    %c0_89 = arith.constant 0 : index
    %229 = vector.load %arg15[%c0_88, %c0_89] : memref<64x32xf32, #tpu.memory_space<vmem>>, vector<64x32xf32>
    %cst_90 = arith.constant dense<0.000000e+00> : vector<16x32xf32>
    %230 = tpu.matmul %228, %229, %cst_90 {dimension_numbers = #tpu.dot_dimension_numbers<[1], [0], [0], [1], [0, 0, 1, 1], [], []>} : vector<16x64xf32>, vector<64x32xf32>, vector<16x32xf32> -> vector<16x32xf32>
    %c0_91 = arith.constant 0 : index
    %c0_92 = arith.constant 0 : index
    %231 = vector.load %arg16[%c0_91, %c0_92] : memref<1x32xf32, #tpu.memory_space<vmem>>, vector<1x32xf32>
    %232 = vector.broadcast %231 : vector<1x32xf32> to vector<16x32xf32>
    %233 = arith.addf %230, %232 : vector<16x32xf32>
    %234 = arith.addf %221, %233 : vector<16x32xf32>
    %c0_93 = arith.constant 0 : index
    %c0_94 = arith.constant 0 : index
    %235 = vector.load %arg17[%c0_93, %c0_94] : memref<1x32xf32, #tpu.memory_space<vmem>>, vector<1x32xf32>
    %c0_95 = arith.constant 0 : index
    %c0_96 = arith.constant 0 : index
    %236 = vector.load %arg18[%c0_95, %c0_96] : memref<1x32xf32, #tpu.memory_space<vmem>>, vector<1x32xf32>
    %cst_97 = arith.constant dense<0.000000e+00> : vector<16xf32>
    %237 = vector.multi_reduction <add>, %234, %cst_97 [1] : vector<16x32xf32> to vector<16xf32>
    %238 = vector.shape_cast %237 : vector<16xf32> to vector<16x1xf32>
    %cst_98 = arith.constant 3.200000e+01 : f32
    %239 = vector.broadcast %cst_98 : f32 to vector<16x1xf32>
    %240 = arith.divf %238, %239 : vector<16x1xf32>
    %241 = vector.broadcast %240 : vector<16x1xf32> to vector<16x32xf32>
    %242 = arith.subf %234, %241 : vector<16x32xf32>
    %243 = arith.mulf %242, %242 : vector<16x32xf32>
    %cst_99 = arith.constant dense<0.000000e+00> : vector<16xf32>
    %244 = vector.multi_reduction <add>, %243, %cst_99 [1] : vector<16x32xf32> to vector<16xf32>
    %245 = vector.shape_cast %244 : vector<16xf32> to vector<16x1xf32>
    %cst_100 = arith.constant 3.200000e+01 : f32
    %246 = vector.broadcast %cst_100 : f32 to vector<16x1xf32>
    %247 = arith.divf %245, %246 : vector<16x1xf32>
    %248 = vector.broadcast %240 : vector<16x1xf32> to vector<16x32xf32>
    %249 = arith.subf %234, %248 : vector<16x32xf32>
    %cst_101 = arith.constant 9.99999974E-6 : f32
    %250 = vector.broadcast %cst_101 : f32 to vector<16x1xf32>
    %251 = arith.addf %247, %250 : vector<16x1xf32>
    %252 = math.rsqrt %251 : vector<16x1xf32>
    %253 = vector.broadcast %252 : vector<16x1xf32> to vector<16x32xf32>
    %254 = arith.mulf %249, %253 : vector<16x32xf32>
    %255 = vector.broadcast %235 : vector<1x32xf32> to vector<16x32xf32>
    %256 = arith.mulf %254, %255 : vector<16x32xf32>
    %257 = vector.broadcast %236 : vector<1x32xf32> to vector<16x32xf32>
    %258 = arith.addf %256, %257 : vector<16x32xf32>
    %c0_102 = arith.constant 0 : index
    %c0_103 = arith.constant 0 : index
    %259 = vector.load %arg3[%c0_102, %c0_103] : memref<16x1xf32, #tpu.memory_space<vmem>>, vector<16x1xf32>
    %260 = vector.broadcast %259 : vector<16x1xf32> to vector<16x32xf32>
    %261 = arith.mulf %258, %260 : vector<16x32xf32>
    %c0_104 = arith.constant 0 : index
    %c0_105 = arith.constant 0 : index
    %262 = vector.load %arg19[%c0_104, %c0_105] : memref<32x4xf32, #tpu.memory_space<vmem>>, vector<32x4xf32>
    %cst_106 = arith.constant dense<0.000000e+00> : vector<16x4xf32>
    %263 = tpu.matmul %261, %262, %cst_106 {dimension_numbers = #tpu.dot_dimension_numbers<[1], [0], [0], [1], [0, 0, 1, 1], [], []>} : vector<16x32xf32>, vector<32x4xf32>, vector<16x4xf32> -> vector<16x4xf32>
    %c0_107 = arith.constant 0 : index
    %c0_108 = arith.constant 0 : index
    %264 = vector.load %arg20[%c0_107, %c0_108] : memref<1x4xf32, #tpu.memory_space<vmem>>, vector<1x4xf32>
    %265 = vector.broadcast %264 : vector<1x4xf32> to vector<16x4xf32>
    %266 = arith.addf %263, %265 : vector<16x4xf32>
    %267 = vector.shape_cast %266 : vector<16x4xf32> to vector<2x8x4xf32>
    %268 = vector.extract_strided_slice %267 {offsets = [0, 0, 0], sizes = [2, 6, 4], strides = [1, 1, 1]} : vector<2x8x4xf32> to vector<2x6x4xf32>
    %c0_109 = arith.constant 0 : index
    %c0_110 = arith.constant 0 : index
    %c0_111 = arith.constant 0 : index
    %269 = vector.load %arg4[%c0_109, %c0_110, %c0_111] : memref<2x6x1xf32, #tpu.memory_space<vmem>>, vector<2x6x1xf32>
    %270 = vector.broadcast %269 : vector<2x6x1xf32> to vector<2x6x4xf32>
    %271 = arith.mulf %268, %270 : vector<2x6x4xf32>
    %c0_112 = arith.constant 0 : index
    %c0_113 = arith.constant 0 : index
    %c0_114 = arith.constant 0 : index
    %272 = vector.load %arg21[%c0_112, %c0_113, %c0_114] : memref<2x6x4xf32, #tpu.memory_space<vmem>>, vector<2x6x4xf32>
    tpu.vector_store %arg21[%c0_112, %c0_113, %c0_114], %271 {strides = array<i32>} : memref<2x6x4xf32, #tpu.memory_space<vmem>>, vector<2x6x4xf32>,
    return
  }
  func.func @transform_0(%arg0: i32) -> (i32, i32) {
    %c0_i32 = arith.constant 0 : i32
    %c0_i32_0 = arith.constant 0 : i32
    return %arg0, %c0_i32 : i32, i32
  }
  func.func @transform_1(%arg0: i32) -> (i32, i32, i32) {
    %c0_i32 = arith.constant 0 : i32
    %c0_i32_0 = arith.constant 0 : i32
    %c0_i32_1 = arith.constant 0 : i32
    return %arg0, %c0_i32, %c0_i32_0 : i32, i32, i32
  }
  func.func @transform_2(%arg0: i32) -> (i32, i32) {
    %c0_i32 = arith.constant 0 : i32
    %c0_i32_0 = arith.constant 0 : i32
    return %arg0, %c0_i32 : i32, i32
  }
  func.func @transform_3(%arg0: i32) -> (i32, i32, i32) {
    %c0_i32 = arith.constant 0 : i32
    %c0_i32_0 = arith.constant 0 : i32
    %c0_i32_1 = arith.constant 0 : i32
    return %arg0, %c0_i32, %c0_i32_0 : i32, i32, i32
  }
  func.func @transform_4(%arg0: i32) -> (i32, i32) {
    %c0_i32 = arith.constant 0 : i32
    %c0_i32_0 = arith.constant 0 : i32
    return %arg0, %c0_i32 : i32, i32
  }
  func.func @transform_5(%arg0: i32) -> (i32, i32) {
    %c0_i32 = arith.constant 0 : i32
    %c0_i32_0 = arith.constant 0 : i32
    %c0_i32_1 = arith.constant 0 : i32
    return %c0_i32, %c0_i32_0 : i32, i32
  }
  func.func @transform_6(%arg0: i32) -> (i32, i32) {
    %c0_i32 = arith.constant 0 : i32
    %c0_i32_0 = arith.constant 0 : i32
    %c0_i32_1 = arith.constant 0 : i32
    return %c0_i32, %c0_i32_0 : i32, i32
  }
  func.func @transform_7(%arg0: i32) -> (i32, i32) {
    %c0_i32 = arith.constant 0 : i32
    %c0_i32_0 = arith.constant 0 : i32
    %c0_i32_1 = arith.constant 0 : i32
    return %c0_i32, %c0_i32_0 : i32, i32
  }
  func.func @transform_8(%arg0: i32) -> (i32, i32, i32) {
    %c0_i32 = arith.constant 0 : i32
    %c0_i32_0 = arith.constant 0 : i32
    %c0_i32_1 = arith.constant 0 : i32
    %c0_i32_2 = arith.constant 0 : i32
    return %c0_i32, %c0_i32_0, %c0_i32_1 : i32, i32, i32
  }
  func.func @transform_9(%arg0: i32) -> (i32, i32) {
    %c0_i32 = arith.constant 0 : i32
    %c0_i32_0 = arith.constant 0 : i32
    %c0_i32_1 = arith.constant 0 : i32
    return %c0_i32, %c0_i32_0 : i32, i32
  }
  func.func @transform_10(%arg0: i32) -> (i32, i32) {
    %c0_i32 = arith.constant 0 : i32
    %c0_i32_0 = arith.constant 0 : i32
    %c0_i32_1 = arith.constant 0 : i32
    return %c0_i32, %c0_i32_0 : i32, i32
  }
  func.func @transform_11(%arg0: i32) -> (i32, i32) {
    %c0_i32 = arith.constant 0 : i32
    %c0_i32_0 = arith.constant 0 : i32
    %c0_i32_1 = arith.constant 0 : i32
    return %c0_i32, %c0_i32_0 : i32, i32
  }
  func.func @transform_12(%arg0: i32) -> (i32, i32) {
    %c0_i32 = arith.constant 0 : i32
    %c0_i32_0 = arith.constant 0 : i32
    %c0_i32_1 = arith.constant 0 : i32
    return %c0_i32, %c0_i32_0 : i32, i32
  }
  func.func @transform_13(%arg0: i32) -> (i32, i32) {
    %c0_i32 = arith.constant 0 : i32
    %c0_i32_0 = arith.constant 0 : i32
    %c0_i32_1 = arith.constant 0 : i32
    return %c0_i32, %c0_i32_0 : i32, i32
  }
  func.func @transform_14(%arg0: i32) -> (i32, i32) {
    %c0_i32 = arith.constant 0 : i32
    %c0_i32_0 = arith.constant 0 : i32
    %c0_i32_1 = arith.constant 0 : i32
    return %c0_i32, %c0_i32_0 : i32, i32
  }
  func.func @transform_15(%arg0: i32) -> (i32, i32) {
    %c0_i32 = arith.constant 0 : i32
    %c0_i32_0 = arith.constant 0 : i32
    %c0_i32_1 = arith.constant 0 : i32
    return %c0_i32, %c0_i32_0 : i32, i32
  }
  func.func @transform_16(%arg0: i32) -> (i32, i32) {
    %c0_i32 = arith.constant 0 : i32
    %c0_i32_0 = arith.constant 0 : i32
    %c0_i32_1 = arith.constant 0 : i32
    return %c0_i32, %c0_i32_0 : i32, i32
  }
  func.func @transform_17(%arg0: i32) -> (i32, i32) {
    %c0_i32 = arith.constant 0 : i32
    %c0_i32_0 = arith.constant 0 : i32
    %c0_i32_1 = arith.constant 0 : i32
    return %c0_i32, %c0_i32_0 : i32, i32
  }
  func.func @transform_18(%arg0: i32) -> (i32, i32) {
    %c0_i32 = arith.constant 0 : i32
    %c0_i32_0 = arith.constant 0 : i32
    %c0_i32_1 = arith.constant 0 : i32
    return %c0_i32, %c0_i32_0 : i32, i32
  }
  func.func @transform_19(%arg0: i32) -> (i32, i32) {
    %c0_i32 = arith.constant 0 : i32
    %c0_i32_0 = arith.constant 0 : i32
    %c0_i32_1 = arith.constant 0 : i32
    return %c0_i32, %c0_i32_0 : i32, i32
  }
  func.func @transform_20(%arg0: i32) -> (i32, i32, i32) {
    %c0_i32 = arith.constant 0 : i32
    %c0_i32_0 = arith.constant 0 : i32
    %c0_i32_1 = arith.constant 0 : i32
    return %arg0, %c0_i32, %c0_i32_0 : i32, i32, i32
  }
}

</mosaic_0001>

<bundles_post_ra>
// kernel: tpu_custom_call.1
= control target key start
LH: loop header
LB: loop body
LE: loop exit
PB: predicated region body
PF: predicated region fallthrough
CT: control target
= control target key end

     0   :  { %vm77_vm0 = vcmask 1043456   ;;  %vm70_vm1 = vcmask 31744   ;;  %vm167_vm2 = vcmask 261120   ;;  %v4600_v13 = vmov 0.0   ;;  %s4604_s22 = smov 92   ;;  %s4606_s24 = smov 60   ;;  %s5227_s5 = inlined_call_operand.vmem [shape: f32[4,32], index: 5, kind: input, shape index: {}]   ;;  %s5228_s0 = inlined_call_operand.vmem [shape: f32[16,4], index: 0, kind: input, shape index: {}]   ;;  %s5229_s6 = inlined_call_operand.vmem [shape: f32[32,96], index: 6, kind: input, shape index: {}]   ;;  %s5230_s4 = inlined_call_operand.vmem [shape: f32[16,32], index: 4, kind: input, shape index: {}]   ;;  %s5231_s7 = inlined_call_operand.vmem [shape: f32[1,96], index: 7, kind: input, shape index: {}]   ;;  %s5232_s1 = inlined_call_operand.vmem [shape: f32[2,1,8], index: 1, kind: input, shape index: {}]   ;;  %s5233_s8 = inlined_call_operand.vmem [shape: f32[8,4,32], index: 8, kind: input, shape index: {}]   ;;  %s5234_s9 = inlined_call_operand.vmem [shape: f32[1,32], index: 9, kind: input, shape index: {}]   ;;  %s5235_s12 = inlined_call_operand.vmem [shape: f32[32,64], index: 12, kind: input, shape index: {}]   ;;  %s5236_s14 = inlined_call_operand.vmem [shape: f32[64,32], index: 14, kind: input, shape index: {}]   ;;  %s5237_s10 = inlined_call_operand.vmem [shape: f32[1,32], index: 10, kind: input, shape index: {}]   ;;  %s5238_s11 = inlined_call_operand.vmem [shape: f32[1,32], index: 11, kind: input, shape index: {}]   ;;  %s5239_s13 = inlined_call_operand.vmem [shape: f32[1,64], index: 13, kind: input, shape index: {}]   ;;  %s5240_s15 = inlined_call_operand.vmem [shape: f32[1,32], index: 15, kind: input, shape index: {}]   ;;  %s5241_s2 = inlined_call_operand.vmem [shape: f32[16,1], index: 2, kind: input, shape index: {}]   ;;  %s5242_s3 = inlined_call_operand.vmem [shape: f32[2,6,1], index: 3, kind: input, shape index: {}]   ;;  %s5243_s18 = inlined_call_operand.vmem [shape: f32[32,4], index: 18, kind: input, shape index: {}]   ;;  %s5244_s16 = inlined_call_operand.vmem [shape: f32[1,32], index: 16, kind: input, shape index: {}]   ;;  %s5245_s17 = inlined_call_operand.vmem [shape: f32[1,32], index: 17, kind: input, shape index: {}]   ;;  %s5246_s19 = inlined_call_operand.vmem [shape: f32[1,4], index: 19, kind: input, shape index: {}]   ;;  %s5247_s20 = inlined_call_operand.vmem [shape: f32[2,6,4], index: 20, kind: output, shape index: {}]  }
   0x1   :  { %5251 = sst [smem:[#allocation2_spill]] %s5227_s5  ;;  %vm4601_vm3 = vmmov 0   ;;  %v4800_v21 = vld [vmem:[%s5232_s1] ss:$0 sm:$0xff]  ;;  %vm417_vm4 = vcmask 64512   ;;  %s4610_s29 = smov 84  }
   0x2   :  { %5252 = sst [smem:[#allocation3_spill]] %s5228_s0  ;;  %v4806_v25 = vld [vmem:[%s5232_s1 + $0x1] ss:$0 sm:$0xff]  ;;  %s4603_s0 = smov 64   ;;  %vm3766_vm5 = vcmask 523264   ;;  %vm4014_vm6 = vcmask 29696  }
   0x3   :  { %5253 = sst [smem:[#allocation4_spill]] %s5229_s6  ;;  %s4611_s30 = smov 116  }
   0x4   :  { %5254 = sst [smem:[#allocation5_spill]] %s5230_s4  ;;  %s4616_s4 = smov 76  }
   0x5   :  { %5255 = sst [smem:[#allocation6_spill]] %s5231_s7  ;;  %s4617_s26 = smov 108  }
   0x6   :  { %s5256_s23 = sld [smem:[#allocation2_spill]] }
   0x7   :  { %s5257_s25 = sld [smem:[#allocation3_spill]] }
   0x8   :  { %s5258_s7 = sld [smem:[#allocation4_spill]] }
   0x9   :  { %s5259_s6 = sld [smem:[#allocation5_spill]] }
   0xa   :  { %s5260_s28 = sld [smem:[#allocation6_spill]] }
   0xc   :  { %v67_v0 = vld [vmem:[%s5256_s23] sm:$0xf]  ;;  %s4605_s23 = smov 124  }
   0xd   :  { %v65_v1 = vld [vmem:[%s5257_s25] sm:$0xff]  ;;  %v66_v2 = vld [vmem:[%s5257_s25 + $0x8] sm:$0xff]  ;;  %4241 = vmatprep.subr.msk.mxu0 %vm77_vm0, %v67_v0  ;;  %s4608_s25 = smov 88  }
   0xe   :  { %4243 = vmatprep.mubr.msk.f32.mxu0 %vm70_vm1, %v65_v1  ;;  %v159_v3 = vld [vmem:[%s5258_s7 + $0x18] sm:$0xff]  ;;  %4242 = vmatpush3.msk.msra.mxu0 %vm77_vm0, %v67_v0  ;;  %v158_v4 = vld [vmem:[%s5258_s7 + $0x10] sm:$0xff]  ;;  %v157_v5 = vld [vmem:[%s5258_s7 + $0x8] sm:$0xff] }
   0xf   :  { %4246 = vmatprep.subr.mxu1 %v159_v3  ;;  %4244 = vmatmul.mubr.msk.f32.vlgmr.msra.gmra.mxu0 %vm70_vm1, %v66_v2  ;;  %v156_v6 = vld [vmem:[%s5258_s7] sm:$0xff]  ;;  %v69_v9 = vld [vmem:[%s5259_s6 + $0x8] sm:$0xff]  ;;  %s4602_s7 = smov 96  }
  0x10   :  { %4247 = vmatpush3.msra.mxu1 %v159_v3  ;;  %v68_v8 = vld [vmem:[%s5259_s6] sm:$0xff]  ;;  %4257 = vmatprep.subr.mxu0 %v4600_v13  ;;  %s4607_s6 = smov 120  }
  0x11   :  { %4248 = vmatprep.subr.mxu1 %v158_v4  ;;  %4259 = vmatprep.mubr.msk.f32.mxu0 %vm4601_vm3, %v4600_v13  ;;  %v4024_v15 = vld [vmem:[%s5260_s28] ss:$0 sm:$0xff]  ;;  %s4624_s28 = smov 36  }
  0x12   :  { %4249 = vmatpush3.msra.mxu1 %v158_v4 }
  0x13   :  { %4250 = vmatprep.subr.mxu1 %v157_v5 }
  0x14   :  { %4251 = vmatpush3.msra.mxu1 %v157_v5 }
  0x15   :  { %4252 = vmatprep.subr.mxu1 %v156_v6 }
  0x16   :  { %4253 = vmatpush3.msra.mxu1 %v156_v6 }
  0x17   :  { %4267 = vmatprep.subr.mxu1 %v4600_v13 }
  0xcf   :  { %v4245_v7 = vpop.f32.mrf.mxu0 }
  0xd0   :  { %v4764_v12 = vadd.f32 %v4245_v7, %v69_v9 }
  0xd1   :  { %v147_v10 = vpop.f32.mrf.mxu0 }
  0xd2   :  { %v4762_v11 = vadd.f32 %v147_v10, %v68_v8 }
  0xd4   :  { %4254 = vmatprep.mubr.msk.f32.mxu1 %vm167_vm2, %v4762_v11 }
  0xd5   :  { %4255 = vmatmul.mubr.msk.f32.vlgmr.msra.gmra.mxu1 %vm167_vm2, %v4764_v12 }
  0xd6   :  { %4269 = vmatprep.mubr.msk.f32.mxu1 %vm4601_vm3, %v4600_v13 }
 0x195   :  { %v4256_v14 = vpop.f32.mrf.mxu1 }
 0x196   :  { %v4782_v18 = vadd.f32 %v4256_v14, %v4024_v15 }
 0x197   :  { %v240_v16 = vpop.f32.mrf.mxu1 }
 0x198   :  { %v4779_v17 = vadd.f32 %v4024_v15, %v240_v16  ;;  %v592_v15 = vld [vmem:[%s5233_s8] sm:$0xf] }
 0x19a   :  { %264 = vrot.lane.b32.xlu0 %v4779_v17, %s4602_s7 }
 0x19e   :  { %341 = vrot.lane.b32.xlu0 %v4782_v18, %s4602_s7  ;;  %s4609_s7 = smov 56  }
 0x20c   :  { %v265_v19 = vpop.permute.xlu0 %264 }
 0x20d   :  { %4258 = vmatpush3.xpose.msk.msra.mxu0 %vm70_vm1, %v265_v19 }
 0x20e   :  { %4262 = vmatprep.subr.mxu0 %v4600_v13 }
 0x210   :  { %4260 = vmatmul.mubr.msk.f32.vlgmr.msra.gmra.mxu0 %vm70_vm1, %v4779_v17  ;;  %v342_v20 = vpop.permute.xlu0 %341 }
 0x211   :  { %4263 = vmatpush3.xpose.msk.msra.mxu0 %vm70_vm1, %v342_v20  ;;  %4264 = vmatprep.mubr.msk.f32.mxu0 %vm4601_vm3, %v4600_v13 }
 0x212   :  { %4272 = vmatprep.subr.mxu0 %v4600_v13 }
 0x214   :  { %4265 = vmatmul.mubr.msk.f32.vlgmr.msra.gmra.mxu0 %vm70_vm1, %v4782_v18 }
 0x215   :  { %4274 = vmatprep.mubr.msk.f32.mxu0 %vm4601_vm3, %v4600_v13 }
 0x2d0   :  { %v336_v22 = vpop.f32.mrf.mxu0 }
 0x2d1   :  { %v337_v23 = vadd.f32 %v4800_v21, %v336_v22 }
 0x2d2   :  { %v4261_v24 = vpop.f32.mrf.mxu0 }
 0x2d3   :  { %v418_v26 = vsel %vm417_vm4, %v337_v23, -inf }
 0x2d4   :  { %419 = vmax.xlane.f32.xlu1 %v418_v26  ;;  %v413_v27 = vpop.f32.mrf.mxu0 }
 0x2d5   :  { %v414_v28 = vadd.f32 %v4806_v25, %v413_v27 }
 0x2d6   :  { %v4266_v29 = vpop.f32.mrf.mxu0 }
 0x2d7   :  { %v421_v30 = vsel %vm417_vm4, %v414_v28, -inf }
 0x2d8   :  { %422 = vmax.xlane.f32.xlu1 %v421_v30  ;;  %v4041_v30 = vld [vmem:[%s5233_s8 + $0x4] sm:$0xf] }
 0x2e9   :  { %440 = vrot.lane.b32.xlu1 %v4779_v17, %s4603_s0 }
 0x2ed   :  { %516 = vrot.lane.b32.xlu1 %v4782_v18, %s4603_s0  ;;  %s4612_s0 = smov 52  }
 0x2f1   :  { %595 = vrot.lane.b32.xlu1 %v4779_v17, %s4604_s22 }
 0x2f5   :  { %673 = vrot.lane.b32.xlu1 %v4782_v18, %s4604_s22  ;;  %s4613_s22 = smov 80  }
 0x35d   :  { %v420_v31 = vpop.xlane.xlu1 %419 }
 0x35e   :  { %v424_v32 = vsub.f32 %v337_v23, %v420_v31 }
 0x360   :  { %v426_v33 = vmul.f32 1.442695, %v424_v32 }
 0x361   :  { %v423_v34 = vpop.xlane.xlu1 %422 }
 0x362   :  { %4526 = vpow2.f32 %v426_v33  ;;  %v425_v35 = vsub.f32 %v414_v28, %v423_v34 }
 0x364   :  { %v428_v36 = vmul.f32 1.442695, %v425_v35 }
 0x365   :  { %v441_v37 = vpop.permute.xlu1 %440 }
 0x366   :  { %4528 = vpow2.f32 %v428_v36  ;;  %4268 = vmatpush3.msra.mxu1 %v441_v37 }
 0x367   :  { %4277 = vmatprep.subr.mxu1 %v4600_v13 }
 0x369   :  { %v517_v38 = vpop.permute.xlu1 %516 }
 0x36a   :  { %4273 = vmatpush3.msra.mxu0 %v517_v38 }
 0x36b   :  { %4282 = vmatprep.subr.mxu0 %v4600_v13 }
 0x36d   :  { %v596_v43 = vpop.permute.xlu1 %595 }
 0x36f   :  { %v4527_v39 = vpop.eup %4526 }
 0x370   :  { %v430_v40 = vsel %vm417_vm4, %v4527_v39, 0.0 }
 0x371   :  { %431 = vadd.xlane.f32.xlu0 %v430_v40  ;;  %v674_v44 = vpop.permute.xlu1 %673 }
 0x373   :  { %v4529_v41 = vpop.eup %4528 }
 0x374   :  { %v433_v42 = vsel %vm417_vm4, %v4529_v41, 0.0 }
 0x375   :  { %434 = vadd.xlane.f32.xlu1 %v433_v42 }
 0x386   :  { %671 = vrot.lane.b32.xlu1 %v4782_v18, %s4605_s23 }
 0x387   :  { %593 = vrot.lane.b32.xlu0 %v4779_v17, %s4605_s23  ;;  %s4614_s23 = smov 112  }
 0x3fa   :  { %v432_v45 = vpop.xlane.xlu0 %431 }
 0x3fb   :  { %4530 = vrcp.f32 %v432_v45 }
 0x3fe   :  { %v435_v46 = vpop.xlane.xlu1 %434  ;;  %v594_v51 = vpop.permute.xlu0 %593 }
 0x3ff   :  { %4532 = vrcp.f32 %v435_v46 }
 0x402   :  { %v672_v52 = vpop.permute.xlu1 %671 }
 0x408   :  { %v4531_v47 = vpop.eup %4530 }
 0x409   :  { %v438_v48 = vmul.f32 %v4531_v47, %v4527_v39 }
 0x40b   :  { %4270 = vmatmul.mubr.msk.f32.vlgmr.msra.gmra.mxu1 %vm417_vm4, %v438_v48 }
 0x40c   :  { %v4533_v49 = vpop.eup %4532  ;;  %4278 = vmatpush3.xpose.msk.msra.mxu1 %vm70_vm1, %v596_v43  ;;  %4279 = vmatprep.mubr.msk.f32.mxu1 %vm4601_vm3, %v4600_v13 }
 0x40d   :  { %v439_v50 = vmul.f32 %v4533_v49, %v4529_v41  ;;  %4287 = vmatprep.subr.mxu1 %v4600_v13 }
 0x40f   :  { %4275 = vmatmul.mubr.msk.f32.vlgmr.msra.gmra.mxu0 %vm417_vm4, %v439_v50  ;;  %4280 = vmatmul.mubr.msk.f32.vlgmr.msra.gmra.mxu1 %vm70_vm1, %v594_v51 }
 0x410   :  { %4283 = vmatpush3.xpose.msk.msra.mxu0 %vm70_vm1, %v674_v44  ;;  %4284 = vmatprep.mubr.msk.f32.mxu0 %vm4601_vm3, %v4600_v13 }
 0x411   :  { %4292 = vmatprep.subr.mxu0 %v4600_v13  ;;  %4289 = vmatprep.mubr.msk.f32.mxu1 %vm4601_vm3, %v4600_v13 }
 0x413   :  { %4285 = vmatmul.mubr.msk.f32.vlgmr.msra.gmra.mxu0 %vm70_vm1, %v672_v52 }
 0x414   :  { %4294 = vmatprep.mubr.msk.f32.mxu0 %vm4601_vm3, %v4600_v13 }
 0x4cb   :  { %v512_v53 = vpop.f32.mrf.mxu1 }
 0x4cd   :  { %v4271_v54 = vpop.f32.mrf.mxu1 }
 0x4cf   :  { %v588_v55 = vpop.f32.mrf.mxu0  ;;  %v667_v56 = vpop.f32.mrf.mxu1 }
 0x4d0   :  { %v668_v57 = vadd.f32 %v4800_v21, %v667_v56 }
 0x4d1   :  { %v4276_v58 = vpop.f32.mrf.mxu0  ;;  %v4281_v59 = vpop.f32.mrf.mxu1 }
 0x4d2   :  { %v749_v60 = vsel %vm417_vm4, %v668_v57, -inf }
 0x4d3   :  { %v745_v61 = vpop.f32.mrf.mxu0  ;;  %750 = vmax.xlane.f32.xlu1 %v749_v60 }
 0x4d4   :  { %v746_v62 = vadd.f32 %v4806_v25, %v745_v61 }
 0x4d5   :  { %v4286_v63 = vpop.f32.mrf.mxu0 }
 0x4d6   :  { %v752_v0 = vsel %vm417_vm4, %v746_v62, -inf }
 0x4d7   :  { %753 = vmax.xlane.f32.xlu0 %v752_v0 }
 0x4ed   :  { %847 = vrot.lane.b32.xlu0 %v4782_v18, %s4606_s24 }
 0x4f1   :  { %1093 = vrot.lane.b32.xlu0 %v4779_v17, %s4607_s6 }
 0x55c   :  { %v751_v1 = vpop.xlane.xlu1 %750 }
 0x55d   :  { %v755_v2 = vsub.f32 %v668_v57, %v751_v1 }
 0x55f   :  { %v757_v3 = vmul.f32 1.442695, %v755_v2 }
 0x560   :  { %v754_v4 = vpop.xlane.xlu0 %753 }
 0x561   :  { %4534 = vpow2.f32 %v757_v3  ;;  %v756_v5 = vsub.f32 %v746_v62, %v754_v4  ;;  %v4054_v4 = vld [vmem:[%s5233_s8 + $0x8] sm:$0xf] }
 0x563   :  { %v759_v6 = vmul.f32 1.442695, %v756_v5 }
 0x564   :  { %v848_v7 = vpop.permute.xlu0 %847 }
 0x565   :  { %4536 = vpow2.f32 %v759_v6  ;;  %4293 = vmatpush3.msra.mxu0 %v848_v7 }
 0x566   :  { %4302 = vmatprep.subr.msk.mxu0 %vm77_vm0, %v592_v15 }
 0x568   :  { %v1094_v35 = vpop.permute.xlu0 %1093 }
 0x56e   :  { %v4535_v8 = vpop.eup %4534 }
 0x56f   :  { %v761_v9 = vsel %vm417_vm4, %v4535_v8, 0.0 }
 0x570   :  { %762 = vadd.xlane.f32.xlu1 %v761_v9 }
 0x572   :  { %v4537_v10 = vpop.eup %4536 }
 0x573   :  { %v764_v14 = vsel %vm417_vm4, %v4537_v10, 0.0 }
 0x574   :  { %765 = vadd.xlane.f32.xlu1 %v764_v14 }
 0x585   :  { %771 = vrot.lane.b32.xlu1 %v4779_v17, %s4606_s24 }
 0x589   :  { %1095 = vrot.lane.b32.xlu1 %v4779_v17, %s4608_s25 }
 0x58d   :  { %1173 = vrot.lane.b32.xlu1 %v4782_v18, %s4608_s25  ;;  %s4615_s25 = smov 48  }
 0x591   :  { %1171 = vrot.lane.b32.xlu1 %v4782_v18, %s4607_s6 }
 0x5f9   :  { %v763_v16 = vpop.xlane.xlu1 %762 }
 0x5fa   :  { %4538 = vrcp.f32 %v763_v16 }
 0x5fd   :  { %v766_v19 = vpop.xlane.xlu1 %765 }
 0x5fe   :  { %4540 = vrcp.f32 %v766_v19 }
 0x601   :  { %v772_v20 = vpop.permute.xlu1 %771 }
 0x602   :  { %4288 = vmatpush3.msra.mxu1 %v772_v20 }
 0x603   :  { %4297 = vmatprep.subr.msk.mxu1 %vm77_vm0, %v4041_v30 }
 0x605   :  { %v1096_v24 = vpop.permute.xlu1 %1095 }
 0x607   :  { %v4539_v22 = vpop.eup %4538 }
 0x608   :  { %v769_v23 = vmul.f32 %v4539_v22, %v4535_v8 }
 0x609   :  { %v1174_v28 = vpop.permute.xlu1 %1173 }
 0x60a   :  { %4290 = vmatmul.mubr.msk.f32.vlgmr.msra.gmra.mxu1 %vm417_vm4, %v769_v23 }
 0x60b   :  { %v4541_v26 = vpop.eup %4540  ;;  %4298 = vmatpush3.msk.msra.mxu1 %vm77_vm0, %v4041_v30 }
 0x60c   :  { %v770_v27 = vmul.f32 %v4541_v26, %v4537_v10  ;;  %4307 = vmatprep.subr.mxu1 %v4600_v13 }
 0x60d   :  { %v1172_v29 = vpop.permute.xlu1 %1171 }
 0x60e   :  { %4295 = vmatmul.mubr.msk.f32.vlgmr.msra.gmra.mxu0 %vm417_vm4, %v770_v27 }
 0x60f   :  { %4304 = vmatprep.mubr.msk.f32.mxu0 %vm70_vm1, %v512_v53  ;;  %4303 = vmatpush3.msk.msra.mxu0 %vm77_vm0, %v592_v15 }
 0x610   :  { %4312 = vmatprep.subr.mxu0 %v4600_v13 }
 0x612   :  { %4305 = vmatmul.mubr.msk.f32.vlgmr.msra.gmra.mxu0 %vm70_vm1, %v588_v55 }
 0x613   :  { %4313 = vmatpush3.xpose.msk.msra.mxu0 %vm70_vm1, %v1174_v28  ;;  %4314 = vmatprep.mubr.msk.f32.mxu0 %vm4601_vm3, %v4600_v13 }
 0x614   :  { %4322 = vmatprep.subr.mxu0 %v4600_v13 }
 0x616   :  { %4315 = vmatmul.mubr.msk.f32.vlgmr.msra.gmra.mxu0 %vm70_vm1, %v1172_v29 }
 0x617   :  { %4324 = vmatprep.mubr.msk.f32.mxu0 %vm4601_vm3, %v4600_v13 }
 0x6ca   :  { %v843_v31 = vpop.f32.mrf.mxu1 }
 0x6cb   :  { %4299 = vmatprep.mubr.msk.f32.mxu1 %vm70_vm1, %v843_v31 }
 0x6cc   :  { %v4291_v32 = vpop.f32.mrf.mxu1 }
 0x6ce   :  { %v919_v33 = vpop.f32.mrf.mxu0 }
 0x6cf   :  { %4300 = vmatmul.mubr.msk.f32.vlgmr.msra.gmra.mxu1 %vm70_vm1, %v919_v33 }
 0x6d0   :  { %4308 = vmatpush3.xpose.msk.msra.mxu1 %vm70_vm1, %v1096_v24  ;;  %v4296_v34 = vpop.f32.mrf.mxu0  ;;  %4309 = vmatprep.mubr.msk.f32.mxu1 %vm4601_vm3, %v4600_v13 }
 0x6d1   :  { %4317 = vmatprep.subr.mxu1 %v4600_v13 }
 0x6d2   :  { %v4878_v36 = vpop.f32.mrf.mxu0 }
 0x6d3   :  { %4310 = vmatmul.mubr.msk.f32.vlgmr.msra.gmra.mxu1 %vm70_vm1, %v1094_v35 }
 0x6d4   :  { %v4881_v37 = vpop.f32.mrf.mxu0  ;;  %4319 = vmatprep.mubr.msk.f32.mxu1 %vm4601_vm3, %v4600_v13 }
 0x6d6   :  { %v1245_v38 = vpop.f32.mrf.mxu0 }
 0x6d7   :  { %v1246_v39 = vadd.f32 %v4806_v25, %v1245_v38 }
 0x6d8   :  { %v4316_v40 = vpop.f32.mrf.mxu0 }
 0x6d9   :  { %v1252_v41 = vsel %vm417_vm4, %v1246_v39, -inf }
 0x6da   :  { %1253 = vmax.xlane.f32.xlu1 %v1252_v41 }
 0x6eb   :  { %1271 = vrot.lane.b32.xlu1 %v4779_v17, %s4609_s7 }
 0x6ef   :  { %1513 = vrot.lane.b32.xlu1 %v4779_v17, %s4610_s29 }
 0x6f3   :  { %1591 = vrot.lane.b32.xlu1 %v4782_v18, %s4610_s29  ;;  %s4619_s29 = smov 72  }
 0x6f7   :  { %1589 = vrot.lane.b32.xlu1 %v4782_v18, %s4611_s30 }
 0x763   :  { %v1254_v42 = vpop.xlane.xlu1 %1253 }
 0x764   :  { %v1256_v44 = vsub.f32 %v1246_v39, %v1254_v42 }
 0x766   :  { %v1259_v45 = vmul.f32 1.442695, %v1256_v44 }
 0x767   :  { %v1272_v43 = vpop.permute.xlu1 %1271 }
 0x768   :  { %4318 = vmatpush3.msra.mxu1 %v1272_v43  ;;  %4542 = vpow2.f32 %v1259_v45 }
 0x769   :  { %4327 = vmatprep.subr.msk.mxu1 %vm77_vm0, %v4054_v4 }
 0x76b   :  { %v1514_v0 = vpop.permute.xlu1 %1513 }
 0x76f   :  { %v1592_v14 = vpop.permute.xlu1 %1591 }
 0x773   :  { %v1590_v19 = vpop.permute.xlu1 %1589 }
 0x775   :  { %v4543_v52 = vpop.eup %4542 }
 0x776   :  { %v1264_v53 = vsel %vm417_vm4, %v4543_v52, 0.0 }
 0x78f   :  { %v4891_v46 = vpop.f32.mrf.mxu1 }
 0x790   :  { %v1090_v27 = vadd.f32 %v4878_v36, %v4891_v46  ;;  %v4064_v46 = vld [vmem:[%s5233_s8 + $0xc] sm:$0xf] }
 0x791   :  { %v4893_v47 = vpop.f32.mrf.mxu1 }
 0x792   :  { %v1085_v29 = vadd.f32 %v4881_v37, %v4893_v47 }
 0x793   :  { %v1167_v48 = vpop.f32.mrf.mxu1 }
 0x794   :  { %v1168_v49 = vadd.f32 %v4800_v21, %v1167_v48 }
 0x795   :  { %v4311_v50 = vpop.f32.mrf.mxu1 }
 0x796   :  { %v1249_v51 = vsel %vm417_vm4, %v1168_v49, -inf }
 0x797   :  { %1250 = vmax.xlane.f32.xlu0 %v1249_v51 }
 0x79b   :  { %1265 = vadd.xlane.f32.xlu0 %v1264_v53 }
 0x820   :  { %v1251_v54 = vpop.xlane.xlu0 %1250 }
 0x821   :  { %v1255_v55 = vsub.f32 %v1168_v49, %v1251_v54 }
 0x823   :  { %v1257_v56 = vmul.f32 1.442695, %v1255_v55 }
 0x824   :  { %v1266_v59 = vpop.xlane.xlu0 %1265 }
 0x825   :  { %4544 = vpow2.f32 %v1257_v56 }
 0x826   :  { %4546 = vrcp.f32 %v1266_v59 }
 0x832   :  { %v4545_v57 = vpop.eup %4544 }
 0x833   :  { %v1261_v58 = vsel %vm417_vm4, %v4545_v57, 0.0  ;;  %v4547_v61 = vpop.eup %4546 }
 0x834   :  { %1262 = vadd.xlane.f32.xlu0 %v1261_v58  ;;  %v1270_v63 = vmul.f32 %v4547_v61, %v4543_v52 }
 0x84a   :  { %1347 = vrot.lane.b32.xlu0 %v4782_v18, %s4609_s7  ;;  %s4618_s7 = smov 44  }
 0x84e   :  { %1511 = vrot.lane.b32.xlu0 %v4779_v17, %s4611_s30  ;;  %s4620_s30 = smov 104  }
 0x8bd   :  { %v1263_v60 = vpop.xlane.xlu0 %1262 }
 0x8be   :  { %4548 = vrcp.f32 %v1263_v60 }
 0x8c1   :  { %v1348_v62 = vpop.permute.xlu0 %1347 }
 0x8c2   :  { %4323 = vmatpush3.msra.mxu0 %v1348_v62 }
 0x8c3   :  { %4325 = vmatmul.mubr.msk.f32.vlgmr.msra.gmra.mxu0 %vm417_vm4, %v1270_v63  ;;  %4332 = vmatprep.subr.mxu0 %v4600_v13 }
 0x8c4   :  { %4333 = vmatpush3.xpose.msk.msra.mxu0 %vm70_vm1, %v1514_v0  ;;  %4334 = vmatprep.mubr.msk.f32.mxu0 %vm4601_vm3, %v4600_v13 }
 0x8c5   :  { %v1512_v1 = vpop.permute.xlu0 %1511  ;;  %4342 = vmatprep.subr.mxu0 %v4600_v13 }
 0x8c7   :  { %4335 = vmatmul.mubr.msk.f32.vlgmr.msra.gmra.mxu0 %vm70_vm1, %v1512_v1 }
 0x8c8   :  { %4344 = vmatprep.mubr.msk.f32.mxu0 %vm4601_vm3, %v4600_v13 }
 0x8cb   :  { %v4549_v2 = vpop.eup %4548 }
 0x8cc   :  { %v1269_v3 = vmul.f32 %v4549_v2, %v4545_v57 }
 0x8ce   :  { %4320 = vmatmul.mubr.msk.f32.vlgmr.msra.gmra.mxu1 %vm417_vm4, %v1269_v3 }
 0x8cf   :  { %4328 = vmatpush3.msk.msra.mxu1 %vm77_vm0, %v4054_v4 }
 0x8d0   :  { %4337 = vmatprep.subr.mxu1 %v4600_v13 }
 0x983   :  { %v1419_v5 = vpop.f32.mrf.mxu0 }
 0x985   :  { %v4326_v6 = vpop.f32.mrf.mxu0 }
 0x987   :  { %v1585_v7 = vpop.f32.mrf.mxu0 }
 0x988   :  { %v1586_v8 = vadd.f32 %v4800_v21, %v1585_v7 }
 0x989   :  { %v4336_v9 = vpop.f32.mrf.mxu0 }
 0x98a   :  { %v1667_v10 = vsel %vm417_vm4, %v1586_v8, -inf }
 0x98b   :  { %1668 = vmax.xlane.f32.xlu0 %v1667_v10 }
 0x98e   :  { %v1343_v15 = vpop.f32.mrf.mxu1 }
 0x98f   :  { %4329 = vmatprep.mubr.msk.f32.mxu1 %vm70_vm1, %v1343_v15 }
 0x990   :  { %v4321_v16 = vpop.f32.mrf.mxu1  ;;  %4330 = vmatmul.mubr.msk.f32.vlgmr.msra.gmra.mxu1 %vm70_vm1, %v1419_v5 }
 0x991   :  { %4338 = vmatpush3.xpose.msk.msra.mxu1 %vm70_vm1, %v1592_v14  ;;  %4339 = vmatprep.mubr.msk.f32.mxu1 %vm4601_vm3, %v4600_v13 }
 0x992   :  { %4347 = vmatprep.subr.mxu1 %v4600_v13 }
 0x994   :  { %4340 = vmatmul.mubr.msk.f32.vlgmr.msra.gmra.mxu1 %vm70_vm1, %v1590_v19 }
 0x995   :  { %4349 = vmatprep.mubr.msk.f32.mxu1 %vm4601_vm3, %v4600_v13 }
 0xa14   :  { %v1669_v20 = vpop.xlane.xlu0 %1668 }
 0xa15   :  { %v1673_v22 = vsub.f32 %v1586_v8, %v1669_v20 }
 0xa17   :  { %v1675_v23 = vmul.f32 1.442695, %v1673_v22 }
 0xa19   :  { %4550 = vpow2.f32 %v1675_v23 }
 0xa26   :  { %v4551_v24 = vpop.eup %4550 }
 0xa27   :  { %v1679_v26 = vsel %vm417_vm4, %v4551_v24, 0.0 }
 0xa28   :  { %1680 = vadd.xlane.f32.xlu0 %v1679_v26 }
 0xa50   :  { %v4331_v28 = vpop.f32.mrf.mxu1 }
 0xa51   :  { %v4933_v30 = vadd.f32 %v4331_v28, %v1090_v27  ;;  %v4074_v28 = vld [vmem:[%s5233_s8 + $0x10] sm:$0xf] }
 0xa52   :  { %v1500_v31 = vpop.f32.mrf.mxu1 }
 0xa53   :  { %v4935_v32 = vadd.f32 %v1500_v31, %v1085_v29 }
 0xa54   :  { %v1663_v33 = vpop.f32.mrf.mxu1 }
 0xa55   :  { %v1664_v34 = vadd.f32 %v4806_v25, %v1663_v33 }
 0xa56   :  { %v4341_v35 = vpop.f32.mrf.mxu1 }
 0xa57   :  { %v1670_v38 = vsel %vm417_vm4, %v1664_v34, -inf }
 0xa58   :  { %1671 = vmax.xlane.f32.xlu1 %v1670_v38 }
 0xa69   :  { %1689 = vrot.lane.b32.xlu1 %v4779_v17, %s4612_s0 }
 0xa6d   :  { %1931 = vrot.lane.b32.xlu1 %v4779_v17, %s4613_s22 }
 0xa71   :  { %2009 = vrot.lane.b32.xlu1 %v4782_v18, %s4613_s22  ;;  %s4622_s22 = smov 68  }
 0xa75   :  { %2007 = vrot.lane.b32.xlu1 %v4782_v18, %s4614_s23 }
 0xab1   :  { %v1681_v36 = vpop.xlane.xlu0 %1680 }
 0xab2   :  { %4552 = vrcp.f32 %v1681_v36 }
 0xabf   :  { %v4553_v39 = vpop.eup %4552 }
 0xac0   :  { %v1687_v43 = vmul.f32 %v4553_v39, %v4551_v24 }
 0xae1   :  { %v1672_v37 = vpop.xlane.xlu1 %1671 }
 0xae2   :  { %v1674_v40 = vsub.f32 %v1664_v34, %v1672_v37 }
 0xae4   :  { %v1677_v41 = vmul.f32 1.442695, %v1674_v40 }
 0xae5   :  { %v1690_v42 = vpop.permute.xlu1 %1689 }
 0xae6   :  { %4554 = vpow2.f32 %v1677_v41  ;;  %4343 = vmatpush3.msra.mxu0 %v1690_v42 }
 0xae7   :  { %4345 = vmatmul.mubr.msk.f32.vlgmr.msra.gmra.mxu0 %vm417_vm4, %v1687_v43  ;;  %4352 = vmatprep.subr.msk.mxu0 %vm77_vm0, %v4064_v46 }
 0xae8   :  { %4353 = vmatpush3.msk.msra.mxu0 %vm77_vm0, %v4064_v46 }
 0xae9   :  { %4362 = vmatprep.subr.mxu0 %v4600_v13  ;;  %v1932_v51 = vpop.permute.xlu1 %1931 }
 0xaed   :  { %v2010_v55 = vpop.permute.xlu1 %2009 }
 0xaf1   :  { %v2008_v58 = vpop.permute.xlu1 %2007 }
 0xaf3   :  { %v4555_v44 = vpop.eup %4554 }
 0xaf4   :  { %v1682_v45 = vsel %vm417_vm4, %v4555_v44, 0.0 }
 0xaf5   :  { %1683 = vadd.xlane.f32.xlu0 %v1682_v45 }
 0xb0b   :  { %1765 = vrot.lane.b32.xlu0 %v4782_v18, %s4612_s0  ;;  %s4621_s0 = smov 40  }
 0xb0f   :  { %1929 = vrot.lane.b32.xlu0 %v4779_v17, %s4614_s23  ;;  %s4623_s23 = smov 100  }
 0xb7e   :  { %v1684_v47 = vpop.xlane.xlu0 %1683 }
 0xb7f   :  { %4556 = vrcp.f32 %v1684_v47 }
 0xb82   :  { %v1766_v48 = vpop.permute.xlu0 %1765 }
 0xb83   :  { %4348 = vmatpush3.msra.mxu1 %v1766_v48 }
 0xb84   :  { %4357 = vmatprep.subr.mxu1 %v4600_v13 }
 0xb86   :  { %v1930_v52 = vpop.permute.xlu0 %1929 }
 0xb8c   :  { %v4557_v49 = vpop.eup %4556 }
 0xb8d   :  { %v1688_v50 = vmul.f32 %v4557_v49, %v4555_v44 }
 0xb8f   :  { %4350 = vmatmul.mubr.msk.f32.vlgmr.msra.gmra.mxu1 %vm417_vm4, %v1688_v50 }
 0xb90   :  { %4358 = vmatpush3.xpose.msk.msra.mxu1 %vm70_vm1, %v1932_v51  ;;  %4359 = vmatprep.mubr.msk.f32.mxu1 %vm4601_vm3, %v4600_v13 }
 0xb91   :  { %4367 = vmatprep.subr.mxu1 %v4600_v13 }
 0xb93   :  { %4360 = vmatmul.mubr.msk.f32.vlgmr.msra.gmra.mxu1 %vm70_vm1, %v1930_v52 }
 0xb94   :  { %4369 = vmatprep.mubr.msk.f32.mxu1 %vm4601_vm3, %v4600_v13 }
 0xba7   :  { %v1761_v53 = vpop.f32.mrf.mxu0 }
 0xba8   :  { %4354 = vmatprep.mubr.msk.f32.mxu0 %vm70_vm1, %v1761_v53 }
 0xba9   :  { %v4346_v54 = vpop.f32.mrf.mxu0 }
 0xc4f   :  { %v1837_v56 = vpop.f32.mrf.mxu1 }
 0xc50   :  { %4355 = vmatmul.mubr.msk.f32.vlgmr.msra.gmra.mxu0 %vm70_vm1, %v1837_v56 }
 0xc51   :  { %4363 = vmatpush3.xpose.msk.msra.mxu0 %vm70_vm1, %v2010_v55  ;;  %v4351_v57 = vpop.f32.mrf.mxu1  ;;  %4364 = vmatprep.mubr.msk.f32.mxu0 %vm4601_vm3, %v4600_v13 }
 0xc52   :  { %4372 = vmatprep.subr.mxu0 %v4600_v13 }
 0xc53   :  { %v2003_v59 = vpop.f32.mrf.mxu1 }
 0xc54   :  { %v2004_v60 = vadd.f32 %v4800_v21, %v2003_v59  ;;  %4365 = vmatmul.mubr.msk.f32.vlgmr.msra.gmra.mxu0 %vm70_vm1, %v2008_v58 }
 0xc55   :  { %v4361_v61 = vpop.f32.mrf.mxu1  ;;  %4374 = vmatprep.mubr.msk.f32.mxu0 %vm4601_vm3, %v4600_v13 }
 0xc56   :  { %v2085_v62 = vsel %vm417_vm4, %v2004_v60, -inf }
 0xc57   :  { %2086 = vmax.xlane.f32.xlu0 %v2085_v62 }
 0xce0   :  { %v2087_v63 = vpop.xlane.xlu0 %2086 }
 0xce1   :  { %v2091_v0 = vsub.f32 %v2004_v60, %v2087_v63 }
 0xce3   :  { %v2093_v1 = vmul.f32 1.442695, %v2091_v0 }
 0xce5   :  { %4558 = vpow2.f32 %v2093_v1 }
 0xcf2   :  { %v4559_v2 = vpop.eup %4558 }
 0xcf3   :  { %v2097_v3 = vsel %vm417_vm4, %v4559_v2, 0.0 }
 0xcf4   :  { %2098 = vadd.xlane.f32.xlu0 %v2097_v3  ;;  %v4084_v3 = vld [vmem:[%s5233_s8 + $0x14] sm:$0xf] }
 0xd10   :  { %v4356_v4 = vpop.f32.mrf.mxu0 }
 0xd11   :  { %v4975_v5 = vadd.f32 %v4356_v4, %v4933_v30 }
 0xd12   :  { %v1918_v6 = vpop.f32.mrf.mxu0 }
 0xd13   :  { %v4978_v7 = vadd.f32 %v1918_v6, %v4935_v32 }
 0xd14   :  { %v2081_v8 = vpop.f32.mrf.mxu0 }
 0xd15   :  { %v2082_v9 = vadd.f32 %v4806_v25, %v2081_v8 }
 0xd16   :  { %v4366_v10 = vpop.f32.mrf.mxu0 }
 0xd17   :  { %v2088_v14 = vsel %vm417_vm4, %v2082_v9, -inf }
 0xd18   :  { %2089 = vmax.xlane.f32.xlu1 %v2088_v14 }
 0xd29   :  { %2107 = vrot.lane.b32.xlu1 %v4779_v17, %s4615_s25 }
 0xd2d   :  { %2349 = vrot.lane.b32.xlu1 %v4779_v17, %s4616_s4 }
 0xd31   :  { %2427 = vrot.lane.b32.xlu1 %v4782_v18, %s4616_s4 }
 0xd35   :  { %2425 = vrot.lane.b32.xlu1 %v4782_v18, %s4617_s26 }
 0xd7d   :  { %v2099_v15 = vpop.xlane.xlu0 %2098 }
 0xd7e   :  { %4560 = vrcp.f32 %v2099_v15 }
 0xd8b   :  { %v4561_v19 = vpop.eup %4560 }
 0xd8c   :  { %v2105_v24 = vmul.f32 %v4561_v19, %v4559_v2 }
 0xda1   :  { %v2090_v16 = vpop.xlane.xlu1 %2089 }
 0xda2   :  { %v2092_v20 = vsub.f32 %v2082_v9, %v2090_v16 }
 0xda4   :  { %v2095_v22 = vmul.f32 1.442695, %v2092_v20 }
 0xda5   :  { %v2108_v23 = vpop.permute.xlu1 %2107 }
 0xda6   :  { %4562 = vpow2.f32 %v2095_v22  ;;  %4368 = vmatpush3.msra.mxu1 %v2108_v23 }
 0xda7   :  { %4370 = vmatmul.mubr.msk.f32.vlgmr.msra.gmra.mxu1 %vm417_vm4, %v2105_v24  ;;  %4377 = vmatprep.subr.msk.mxu1 %vm77_vm0, %v4074_v28 }
 0xda8   :  { %4378 = vmatpush3.msk.msra.mxu1 %vm77_vm0, %v4074_v28 }
 0xda9   :  { %4387 = vmatprep.subr.mxu1 %v4600_v13  ;;  %v2350_v33 = vpop.permute.xlu1 %2349 }
 0xdad   :  { %v2428_v36 = vpop.permute.xlu1 %2427 }
 0xdb1   :  { %v2426_v40 = vpop.permute.xlu1 %2425 }
 0xdb3   :  { %v4563_v26 = vpop.eup %4562 }
 0xdb4   :  { %v2100_v27 = vsel %vm417_vm4, %v4563_v26, 0.0 }
 0xdb5   :  { %2101 = vadd.xlane.f32.xlu0 %v2100_v27 }
 0xdcb   :  { %2183 = vrot.lane.b32.xlu0 %v4782_v18, %s4615_s25 }
 0xdcf   :  { %2347 = vrot.lane.b32.xlu0 %v4779_v17, %s4617_s26 }
 0xe3e   :  { %v2102_v29 = vpop.xlane.xlu0 %2101 }
 0xe3f   :  { %4564 = vrcp.f32 %v2102_v29 }
 0xe42   :  { %v2184_v30 = vpop.permute.xlu0 %2183 }
 0xe43   :  { %4373 = vmatpush3.msra.mxu0 %v2184_v30 }
 0xe44   :  { %4382 = vmatprep.subr.mxu0 %v4600_v13 }
 0xe46   :  { %v2348_v34 = vpop.permute.xlu0 %2347 }
 0xe4c   :  { %v4565_v31 = vpop.eup %4564 }
 0xe4d   :  { %v2106_v32 = vmul.f32 %v4565_v31, %v4563_v26 }
 0xe4f   :  { %4375 = vmatmul.mubr.msk.f32.vlgmr.msra.gmra.mxu0 %vm417_vm4, %v2106_v32 }
 0xe50   :  { %4383 = vmatpush3.xpose.msk.msra.mxu0 %vm70_vm1, %v2350_v33  ;;  %4384 = vmatprep.mubr.msk.f32.mxu0 %vm4601_vm3, %v4600_v13 }
 0xe51   :  { %4392 = vmatprep.subr.mxu0 %v4600_v13 }
 0xe53   :  { %4385 = vmatmul.mubr.msk.f32.vlgmr.msra.gmra.mxu0 %vm70_vm1, %v2348_v34 }
 0xe54   :  { %4394 = vmatprep.mubr.msk.f32.mxu0 %vm4601_vm3, %v4600_v13 }
 0xe67   :  { %v2179_v35 = vpop.f32.mrf.mxu1 }
 0xe68   :  { %4379 = vmatprep.mubr.msk.f32.mxu1 %vm70_vm1, %v2179_v35 }
 0xe69   :  { %v4371_v38 = vpop.f32.mrf.mxu1 }
 0xf0f   :  { %v2255_v37 = vpop.f32.mrf.mxu0 }
 0xf10   :  { %4380 = vmatmul.mubr.msk.f32.vlgmr.msra.gmra.mxu1 %vm70_vm1, %v2255_v37 }
 0xf11   :  { %4388 = vmatpush3.xpose.msk.msra.mxu1 %vm70_vm1, %v2428_v36  ;;  %v4376_v39 = vpop.f32.mrf.mxu0  ;;  %4389 = vmatprep.mubr.msk.f32.mxu1 %vm4601_vm3, %v4600_v13 }
 0xf12   :  { %4397 = vmatprep.subr.mxu1 %v4600_v13 }
 0xf13   :  { %v2421_v41 = vpop.f32.mrf.mxu0 }
 0xf14   :  { %v2422_v42 = vadd.f32 %v4800_v21, %v2421_v41  ;;  %4390 = vmatmul.mubr.msk.f32.vlgmr.msra.gmra.mxu1 %vm70_vm1, %v2426_v40 }
 0xf15   :  { %v4386_v43 = vpop.f32.mrf.mxu0  ;;  %4399 = vmatprep.mubr.msk.f32.mxu1 %vm4601_vm3, %v4600_v13 }
 0xf16   :  { %v2503_v44 = vsel %vm417_vm4, %v2422_v42, -inf }
 0xf17   :  { %2504 = vmax.xlane.f32.xlu0 %v2503_v44 }
 0xfa0   :  { %v2505_v45 = vpop.xlane.xlu0 %2504 }
 0xfa1   :  { %v2509_v46 = vsub.f32 %v2422_v42, %v2505_v45 }
 0xfa3   :  { %v2511_v47 = vmul.f32 1.442695, %v2509_v46 }
 0xfa5   :  { %4566 = vpow2.f32 %v2511_v47  ;;  %v4094_v47 = vld [vmem:[%s5233_s8 + $0x18] sm:$0xf] }
 0xfb2   :  { %v4567_v48 = vpop.eup %4566 }
 0xfb3   :  { %v2515_v49 = vsel %vm417_vm4, %v4567_v48, 0.0 }
 0xfb4   :  { %2516 = vadd.xlane.f32.xlu0 %v2515_v49 }
 0xfd0   :  { %v4381_v50 = vpop.f32.mrf.mxu1 }
 0xfd1   :  { %v5018_v51 = vadd.f32 %v4381_v50, %v4975_v5 }
 0xfd2   :  { %v2336_v52 = vpop.f32.mrf.mxu1 }
 0xfd3   :  { %v5021_v53 = vadd.f32 %v2336_v52, %v4978_v7 }
 0xfd4   :  { %v2499_v54 = vpop.f32.mrf.mxu1 }
 0xfd5   :  { %v2500_v55 = vadd.f32 %v4806_v25, %v2499_v54 }
 0xfd6   :  { %v4391_v56 = vpop.f32.mrf.mxu1 }
 0xfd7   :  { %v2506_v57 = vsel %vm417_vm4, %v2500_v55, -inf }
 0xfd8   :  { %2507 = vmax.xlane.f32.xlu1 %v2506_v57 }
 0xfe9   :  { %2525 = vrot.lane.b32.xlu1 %v4779_v17, %s4618_s7 }
 0xfed   :  { %2767 = vrot.lane.b32.xlu1 %v4779_v17, %s4619_s29 }
 0xff1   :  { %2845 = vrot.lane.b32.xlu1 %v4782_v18, %s4619_s29 }
 0xff5   :  { %2843 = vrot.lane.b32.xlu1 %v4782_v18, %s4620_s30 }
0x103d   :  { %v2517_v58 = vpop.xlane.xlu0 %2516 }
0x103e   :  { %4568 = vrcp.f32 %v2517_v58 }
0x104b   :  { %v4569_v60 = vpop.eup %4568 }
0x104c   :  { %v2523_v0 = vmul.f32 %v4569_v60, %v4567_v48 }
0x1061   :  { %v2508_v59 = vpop.xlane.xlu1 %2507 }
0x1062   :  { %v2510_v61 = vsub.f32 %v2500_v55, %v2508_v59 }
0x1064   :  { %v2513_v62 = vmul.f32 1.442695, %v2510_v61  ;;  %v4598_v61 = vld [vmem:[%s5232_s1] ss:$0 sm:$0xff] }
0x1065   :  { %v2526_v63 = vpop.permute.xlu1 %2525 }
0x1066   :  { %4570 = vpow2.f32 %v2513_v62  ;;  %4393 = vmatpush3.msra.mxu0 %v2526_v63 }
0x1067   :  { %4395 = vmatmul.mubr.msk.f32.vlgmr.msra.gmra.mxu0 %vm417_vm4, %v2523_v0  ;;  %4402 = vmatprep.subr.msk.mxu0 %vm77_vm0, %v4084_v3 }
0x1068   :  { %4403 = vmatpush3.msk.msra.mxu0 %vm77_vm0, %v4084_v3 }
0x1069   :  { %4412 = vmatprep.subr.mxu0 %v4600_v13  ;;  %v2768_v8 = vpop.permute.xlu1 %2767 }
0x106d   :  { %v2846_v15 = vpop.permute.xlu1 %2845 }
0x1071   :  { %v2844_v20 = vpop.permute.xlu1 %2843 }
0x1073   :  { %v4571_v1 = vpop.eup %4570 }
0x1074   :  { %v2518_v2 = vsel %vm417_vm4, %v4571_v1, 0.0 }
0x1075   :  { %2519 = vadd.xlane.f32.xlu0 %v2518_v2 }
0x108b   :  { %2601 = vrot.lane.b32.xlu0 %v4782_v18, %s4618_s7 }
0x108f   :  { %2765 = vrot.lane.b32.xlu0 %v4779_v17, %s4620_s30 }
0x10fe   :  { %v2520_v4 = vpop.xlane.xlu0 %2519 }
0x10ff   :  { %4572 = vrcp.f32 %v2520_v4 }
0x1102   :  { %v2602_v5 = vpop.permute.xlu0 %2601 }
0x1103   :  { %4398 = vmatpush3.msra.mxu1 %v2602_v5 }
0x1104   :  { %4407 = vmatprep.subr.mxu1 %v4600_v13 }
0x1106   :  { %v2766_v9 = vpop.permute.xlu0 %2765 }
0x110c   :  { %v4573_v6 = vpop.eup %4572 }
0x110d   :  { %v2524_v7 = vmul.f32 %v4573_v6, %v4571_v1 }
0x110f   :  { %4400 = vmatmul.mubr.msk.f32.vlgmr.msra.gmra.mxu1 %vm417_vm4, %v2524_v7 }
0x1110   :  { %4408 = vmatpush3.xpose.msk.msra.mxu1 %vm70_vm1, %v2768_v8  ;;  %4409 = vmatprep.mubr.msk.f32.mxu1 %vm4601_vm3, %v4600_v13 }
0x1111   :  { %4417 = vmatprep.subr.mxu1 %v4600_v13 }
0x1113   :  { %4410 = vmatmul.mubr.msk.f32.vlgmr.msra.gmra.mxu1 %vm70_vm1, %v2766_v9 }
0x1114   :  { %4419 = vmatprep.mubr.msk.f32.mxu1 %vm4601_vm3, %v4600_v13 }
0x1127   :  { %v2597_v10 = vpop.f32.mrf.mxu0 }
0x1128   :  { %4404 = vmatprep.mubr.msk.f32.mxu0 %vm70_vm1, %v2597_v10 }
0x1129   :  { %v4396_v14 = vpop.f32.mrf.mxu0 }
0x11cf   :  { %v2673_v16 = vpop.f32.mrf.mxu1 }
0x11d0   :  { %4405 = vmatmul.mubr.msk.f32.vlgmr.msra.gmra.mxu0 %vm70_vm1, %v2673_v16 }
0x11d1   :  { %4413 = vmatpush3.xpose.msk.msra.mxu0 %vm70_vm1, %v2846_v15  ;;  %v4401_v19 = vpop.f32.mrf.mxu1  ;;  %4414 = vmatprep.mubr.msk.f32.mxu0 %vm4601_vm3, %v4600_v13 }
0x11d2   :  { %4422 = vmatprep.subr.mxu0 %v4600_v13 }
0x11d3   :  { %v2839_v22 = vpop.f32.mrf.mxu1 }
0x11d4   :  { %v2840_v23 = vadd.f32 %v4800_v21, %v2839_v22  ;;  %4415 = vmatmul.mubr.msk.f32.vlgmr.msra.gmra.mxu0 %vm70_vm1, %v2844_v20 }
0x11d5   :  { %v4411_v24 = vpop.f32.mrf.mxu1  ;;  %4424 = vmatprep.mubr.msk.f32.mxu0 %vm4601_vm3, %v4600_v13 }
0x11d6   :  { %v2921_v26 = vsel %vm417_vm4, %v2840_v23, -inf }
0x11d7   :  { %2922 = vmax.xlane.f32.xlu0 %v2921_v26 }
0x1260   :  { %v2923_v27 = vpop.xlane.xlu0 %2922 }
0x1261   :  { %v2927_v28 = vsub.f32 %v2840_v23, %v2923_v27 }
0x1263   :  { %v2929_v29 = vmul.f32 1.442695, %v2927_v28 }
0x1265   :  { %4574 = vpow2.f32 %v2929_v29 }
0x1272   :  { %v4575_v30 = vpop.eup %4574 }
0x1273   :  { %v2933_v31 = vsel %vm417_vm4, %v4575_v30, 0.0 }
0x1274   :  { %2934 = vadd.xlane.f32.xlu0 %v2933_v31 }
0x1290   :  { %v4406_v32 = vpop.f32.mrf.mxu0 }
0x1291   :  { %v5061_v21 = vadd.f32 %v4406_v32, %v5018_v51 }
0x1292   :  { %v2754_v33 = vpop.f32.mrf.mxu0 }
0x1293   :  { %v5064_v34 = vadd.f32 %v2754_v33, %v5021_v53 }
0x1294   :  { %v2917_v35 = vpop.f32.mrf.mxu0 }
0x1295   :  { %v2918_v38 = vadd.f32 %v4806_v25, %v2917_v35 }
0x1296   :  { %v4416_v36 = vpop.f32.mrf.mxu0 }
0x1297   :  { %v2924_v37 = vsel %vm417_vm4, %v2918_v38, -inf  ;;  %v4108_v36 = vld [vmem:[%s5234_s9] ss:$0 sm:$0xff] }
0x1298   :  { %2925 = vmax.xlane.f32.xlu1 %v2924_v37 }
0x12a9   :  { %2943 = vrot.lane.b32.xlu1 %v4779_v17, %s4621_s0 }
0x12ad   :  { %3185 = vrot.lane.b32.xlu1 %v4779_v17, %s4622_s22 }
0x12b1   :  { %3263 = vrot.lane.b32.xlu1 %v4782_v18, %s4622_s22 }
0x12b5   :  { %3261 = vrot.lane.b32.xlu1 %v4782_v18, %s4623_s23 }
0x12fd   :  { %v2935_v39 = vpop.xlane.xlu0 %2934 }
0x12fe   :  { %4576 = vrcp.f32 %v2935_v39 }
0x130b   :  { %v4577_v41 = vpop.eup %4576 }
0x130c   :  { %v2941_v44 = vmul.f32 %v4577_v41, %v4575_v30 }
0x1321   :  { %v2926_v40 = vpop.xlane.xlu1 %2925 }
0x1322   :  { %v2928_v25 = vsub.f32 %v2918_v38, %v2926_v40 }
0x1324   :  { %v2931_v42 = vmul.f32 1.442695, %v2928_v25 }
0x1325   :  { %v2944_v43 = vpop.permute.xlu1 %2943 }
0x1326   :  { %4578 = vpow2.f32 %v2931_v42  ;;  %4418 = vmatpush3.msra.mxu1 %v2944_v43 }
0x1327   :  { %4420 = vmatmul.mubr.msk.f32.vlgmr.msra.gmra.mxu1 %vm417_vm4, %v2941_v44  ;;  %4427 = vmatprep.subr.msk.mxu1 %vm77_vm0, %v4094_v47 }
0x1328   :  { %4428 = vmatpush3.msk.msra.mxu1 %vm77_vm0, %v4094_v47 }
0x1329   :  { %4437 = vmatprep.subr.mxu1 %v4600_v13  ;;  %v3186_v52 = vpop.permute.xlu1 %3185 }
0x132d   :  { %v3264_v56 = vpop.permute.xlu1 %3263 }
0x1331   :  { %v3262_v59 = vpop.permute.xlu1 %3261 }
0x1333   :  { %v4579_v45 = vpop.eup %4578 }
0x1334   :  { %v2936_v46 = vsel %vm417_vm4, %v4579_v45, 0.0 }
0x1335   :  { %2937 = vadd.xlane.f32.xlu0 %v2936_v46 }
0x134b   :  { %3019 = vrot.lane.b32.xlu0 %v4782_v18, %s4621_s0 }
0x134f   :  { %3183 = vrot.lane.b32.xlu0 %v4779_v17, %s4623_s23 }
0x13be   :  { %v2938_v48 = vpop.xlane.xlu0 %2937 }
0x13bf   :  { %4580 = vrcp.f32 %v2938_v48 }
0x13c2   :  { %v3020_v49 = vpop.permute.xlu0 %3019 }
0x13c3   :  { %4423 = vmatpush3.msra.mxu0 %v3020_v49 }
0x13c4   :  { %4432 = vmatprep.subr.mxu0 %v4600_v13 }
0x13c6   :  { %v3184_v53 = vpop.permute.xlu0 %3183 }
0x13cc   :  { %v4581_v50 = vpop.eup %4580 }
0x13cd   :  { %v2942_v51 = vmul.f32 %v4581_v50, %v4579_v45 }
0x13cf   :  { %4425 = vmatmul.mubr.msk.f32.vlgmr.msra.gmra.mxu0 %vm417_vm4, %v2942_v51 }
0x13d0   :  { %4433 = vmatpush3.xpose.msk.msra.mxu0 %vm70_vm1, %v3186_v52  ;;  %4434 = vmatprep.mubr.msk.f32.mxu0 %vm4601_vm3, %v4600_v13 }
0x13d1   :  { %4442 = vmatprep.subr.mxu0 %v4600_v13 }
0x13d3   :  { %4435 = vmatmul.mubr.msk.f32.vlgmr.msra.gmra.mxu0 %vm70_vm1, %v3184_v53 }
0x13d4   :  { %4444 = vmatprep.mubr.msk.f32.mxu0 %vm4601_vm3, %v4600_v13 }
0x13e7   :  { %v3015_v54 = vpop.f32.mrf.mxu1 }
0x13e8   :  { %4429 = vmatprep.mubr.msk.f32.mxu1 %vm70_vm1, %v3015_v54 }
0x13e9   :  { %v4421_v55 = vpop.f32.mrf.mxu1 }
0x13ea   :  { %v3659_v55 = vld [vmem:[%s5235_s12 + $0x10] sm:$0xff] }
0x148f   :  { %v3091_v57 = vpop.f32.mrf.mxu0 }
0x1490   :  { %4430 = vmatmul.mubr.msk.f32.vlgmr.msra.gmra.mxu1 %vm70_vm1, %v3091_v57  ;;  %v3657_v57 = vld [vmem:[%s5235_s12] sm:$0xff] }
0x1491   :  { %4438 = vmatpush3.xpose.msk.msra.mxu1 %vm70_vm1, %v3264_v56  ;;  %v4426_v58 = vpop.f32.mrf.mxu0  ;;  %4439 = vmatprep.mubr.msk.f32.mxu1 %vm4601_vm3, %v4600_v13  ;;  %v3658_v56 = vld [vmem:[%s5235_s12 + $0x8] sm:$0xff] }
0x1492   :  { %4447 = vmatprep.subr.mxu1 %v4600_v13  ;;  %v3758_v58 = vld [vmem:[%s5236_s14 + $0x38] sm:$0xff] }
0x1493   :  { %v3257_v60 = vpop.f32.mrf.mxu0 }
0x1494   :  { %v3258_v62 = vadd.f32 %v4598_v61, %v3257_v60  ;;  %4440 = vmatmul.mubr.msk.f32.vlgmr.msra.gmra.mxu1 %vm70_vm1, %v3262_v59  ;;  %v3757_v59 = vld [vmem:[%s5236_s14 + $0x30] sm:$0xff]  ;;  %v3756_v60 = vld [vmem:[%s5236_s14 + $0x28] sm:$0xff]  ;;  %v3755_v61 = vld [vmem:[%s5236_s14 + $0x20] sm:$0xff] }
0x1495   :  { %v4436_v63 = vpop.f32.mrf.mxu0  ;;  %4449 = vmatprep.mubr.msk.f32.mxu1 %vm4601_vm3, %v4600_v13  ;;  %v4599_v13 = vld [vmem:[%s5232_s1 + $0x1] ss:$0 sm:$0xff] }
0x1496   :  { %v3339_v0 = vsel %vm417_vm4, %v3258_v62, -inf }
0x1497   :  { %3340 = vmax.xlane.f32.xlu0 %v3339_v0 }
0x1520   :  { %v3341_v1 = vpop.xlane.xlu0 %3340 }
0x1521   :  { %v3345_v2 = vsub.f32 %v3258_v62, %v3341_v1 }
0x1523   :  { %v3347_v3 = vmul.f32 1.442695, %v3345_v2 }
0x1525   :  { %4582 = vpow2.f32 %v3347_v3 }
0x1532   :  { %v4583_v4 = vpop.eup %4582 }
0x1533   :  { %v3351_v5 = vsel %vm417_vm4, %v4583_v4, 0.0 }
0x1534   :  { %3352 = vadd.xlane.f32.xlu0 %v3351_v5  ;;  %v4109_v5 = vld [vmem:[%s5237_s10] ss:$0 sm:$0xff] }
0x1550   :  { %v4431_v6 = vpop.f32.mrf.mxu1 }
0x1551   :  { %v3182_v7 = vadd.f32 %v4431_v6, %v5061_v21 }
0x1552   :  { %v3172_v8 = vpop.f32.mrf.mxu1 }
0x1553   :  { %v3181_v9 = vadd.f32 %v3172_v8, %v5064_v34 }
0x1554   :  { %v3335_v10 = vpop.f32.mrf.mxu1 }
0x1555   :  { %v3336_v14 = vadd.f32 %v4599_v13, %v3335_v10  ;;  %v4110_v10 = vld [vmem:[%s5238_s11] ss:$0 sm:$0xff] }
0x1556   :  { %v4441_v15 = vpop.f32.mrf.mxu1 }
0x1557   :  { %v3342_v16 = vsel %vm417_vm4, %v3336_v14, -inf }
0x1558   :  { %3343 = vmax.xlane.f32.xlu1 %v3342_v16  ;;  %v3754_v16 = vld [vmem:[%s5236_s14 + $0x18] sm:$0xff] }
0x1569   :  { %3361 = vrot.lane.b32.xlu1 %v4779_v17, %s4624_s28  ;;  %v4104_v17 = vld [vmem:[%s5233_s8 + $0x1c] sm:$0xf] }
0x15bd   :  { %v3353_v19 = vpop.xlane.xlu0 %3352 }
0x15be   :  { %4584 = vrcp.f32 %v3353_v19  ;;  %v3753_v19 = vld [vmem:[%s5236_s14 + $0x10] sm:$0xff] }
0x15cb   :  { %v4585_v22 = vpop.eup %4584 }
0x15cc   :  { %v3359_v27 = vmul.f32 %v4585_v22, %v4583_v4  ;;  %v3751_v22 = vld [vmem:[%s5236_s14] sm:$0xff] }
0x15e1   :  { %v3344_v20 = vpop.xlane.xlu1 %3343 }
0x15e2   :  { %v3346_v23 = vsub.f32 %v3336_v14, %v3344_v20  ;;  %v3752_v20 = vld [vmem:[%s5236_s14 + $0x8] sm:$0xff] }
0x15e4   :  { %v3349_v24 = vmul.f32 1.442695, %v3346_v23  ;;  %v4111_v23 = vld [vmem:[%s5239_s13] ss:$0 sm:$0xff] }
0x15e5   :  { %v3362_v26 = vpop.permute.xlu1 %3361 }
0x15e6   :  { %4586 = vpow2.f32 %v3349_v24  ;;  %4443 = vmatpush3.msra.mxu0 %v3362_v26 }
0x15e7   :  { %4445 = vmatmul.mubr.msk.f32.vlgmr.msra.gmra.mxu0 %vm417_vm4, %v3359_v27  ;;  %4452 = vmatprep.subr.msk.mxu0 %vm77_vm0, %v4104_v17 }
0x15e8   :  { %4453 = vmatpush3.msk.msra.mxu0 %vm77_vm0, %v4104_v17 }
0x15e9   :  { %4468 = vmatprep.subr.mxu0 %v3758_v58 }
0x15f3   :  { %v4587_v28 = vpop.eup %4586 }
0x15f4   :  { %v3354_v29 = vsel %vm417_vm4, %v4587_v28, 0.0 }
0x15f5   :  { %3355 = vadd.xlane.f32.xlu0 %v3354_v29 }
0x160b   :  { %3437 = vrot.lane.b32.xlu0 %v4782_v18, %s4624_s28 }
0x167e   :  { %v3356_v30 = vpop.xlane.xlu0 %3355 }
0x167f   :  { %4588 = vrcp.f32 %v3356_v30  ;;  %v4114_v30 = vld [vmem:[%s5240_s15] ss:$0 sm:$0xff] }
0x1682   :  { %v3438_v31 = vpop.permute.xlu0 %3437 }
0x1683   :  { %4448 = vmatpush3.msra.mxu1 %v3438_v31 }
0x168c   :  { %v4589_v32 = vpop.eup %4588 }
0x168d   :  { %v3360_v21 = vmul.f32 %v4589_v32, %v4587_v28 }
0x168f   :  { %4450 = vmatmul.mubr.msk.f32.vlgmr.msra.gmra.mxu1 %vm417_vm4, %v3360_v21 }
0x16a7   :  { %v3433_v33 = vpop.f32.mrf.mxu0 }
0x16a8   :  { %4454 = vmatprep.mubr.msk.f32.mxu0 %vm70_vm1, %v3433_v33 }
0x16a9   :  { %v4446_v18 = vpop.f32.mrf.mxu0 }
0x174f   :  { %v3509_v34 = vpop.f32.mrf.mxu1 }
0x1750   :  { %4455 = vmatmul.mubr.msk.f32.vlgmr.msra.gmra.mxu0 %vm70_vm1, %v3509_v34 }
0x1751   :  { %v4451_v35 = vpop.f32.mrf.mxu1  ;;  %4469 = vmatpush3.msra.mxu0 %v3758_v58 }
0x1752   :  { %4470 = vmatprep.subr.mxu0 %v3757_v59 }
0x1753   :  { %4471 = vmatpush3.msra.mxu0 %v3757_v59 }
0x1754   :  { %4472 = vmatprep.subr.mxu0 %v3756_v60 }
0x1755   :  { %4473 = vmatpush3.msra.mxu0 %v3756_v60  ;;  %v4117_v60 = vld [vmem:[%s5244_s16] ss:$0 sm:$0xff] }
0x1756   :  { %4474 = vmatprep.subr.mxu0 %v3755_v61 }
0x1757   :  { %4475 = vmatpush3.msra.mxu0 %v3755_v61 }
0x1758   :  { %4476 = vmatprep.subr.mxu0 %v3754_v16 }
0x1759   :  { %4477 = vmatpush3.msra.mxu0 %v3754_v16 }
0x175a   :  { %4478 = vmatprep.subr.mxu0 %v3753_v19 }
0x175b   :  { %4479 = vmatpush3.msra.mxu0 %v3753_v19 }
0x175c   :  { %4480 = vmatprep.subr.mxu0 %v3752_v20 }
0x175d   :  { %4481 = vmatpush3.msra.mxu0 %v3752_v20 }
0x175e   :  { %4482 = vmatprep.subr.mxu0 %v3751_v22 }
0x175f   :  { %4483 = vmatpush3.msra.mxu0 %v3751_v22 }
0x1810   :  { %v4456_v38 = vpop.f32.mrf.mxu0 }
0x1811   :  { %v3600_v37 = vadd.f32 %v4456_v38, %v3182_v7 }
0x1812   :  { %v3590_v39 = vpop.f32.mrf.mxu0 }
0x1813   :  { %v3609_v40 = vadd.f32 %v4108_v36, %v3600_v37  ;;  %v3599_v41 = vadd.f32 %v3590_v39, %v3181_v9 }
0x1815   :  { %v3608_v25 = vadd.f32 %v4108_v36, %v3599_v41  ;;  %v3611_v42 = vadd.f32 %v3609_v40, %v4764_v12  ;;  %v4625_v36 = vmov 0  }
0x1816   :  { %4524 = vset.pattern.permute.xlu1 %v4625_v36  ;;  %4525 = vset.pattern.permute.xlu0 %v4625_v36 }
0x1817   :  { %v3617_v43 = vsel %vm167_vm2, %v3611_v42, 0.0  ;;  %v3610_v44 = vadd.f32 %v3608_v25, %v4762_v11  ;;  %v3660_v11 = vld [vmem:[%s5235_s12 + $0x18] sm:$0xff] }
0x1818   :  { %3618 = vadd.xlane.f32.xlu0 %v3617_v43  ;;  %4457 = vmatprep.subr.mxu1 %v3660_v11 }
0x1819   :  { %v3614_v45 = vsel %vm167_vm2, %v3610_v44, 0.0  ;;  %4458 = vmatpush3.msra.mxu1 %v3660_v11 }
0x181a   :  { %3615 = vadd.xlane.f32.xlu1 %v3614_v45  ;;  %4459 = vmatprep.subr.mxu1 %v3659_v55 }
0x181b   :  { %4460 = vmatpush3.msra.mxu1 %v3659_v55 }
0x181c   :  { %4461 = vmatprep.subr.mxu1 %v3658_v56 }
0x181d   :  { %4462 = vmatpush3.msra.mxu1 %v3658_v56 }
0x181e   :  { %4463 = vmatprep.subr.mxu1 %v3657_v57 }
0x181f   :  { %4464 = vmatpush3.msra.mxu1 %v3657_v57 }
0x18a1   :  { %v3619_v46 = vpop.xlane.xlu0 %3618 }
0x18a2   :  { %v3622_v47 = vmul.f32 0.03125, %v3619_v46 }
0x18a3   :  { %v3616_v48 = vpop.xlane.xlu1 %3615 }
0x18a4   :  { %v3624_v49 = vsub.f32 %v3611_v42, %v3622_v47  ;;  %v3621_v50 = vmul.f32 0.03125, %v3616_v48  ;;  %v3894_v47 = vld [vmem:[%s5241_s2] sm:$0xff]  ;;  %v3895_v48 = vld [vmem:[%s5241_s2 + $0x8] sm:$0xff] }
0x18a6   :  { %v3623_v51 = vsub.f32 %v3610_v44, %v3621_v50  ;;  %v3626_v52 = vmul.f32 %v3624_v49, %v3624_v49  ;;  %v4001_v50 = vld [vmem:[%s5242_s3 + $0x8] sm:$0x3f] }
0x18a8   :  { %v3630_v53 = vsel %vm167_vm2, %v3626_v52, 0.0  ;;  %v3625_v54 = vmul.f32 %v3623_v51, %v3623_v51  ;;  %v3910_v52 = vld [vmem:[%s5243_s18 + $0x10] sm:$0xff] }
0x18a9   :  { %3631 = vadd.xlane.f32.xlu0 %v3630_v53  ;;  %v3909_v53 = vld [vmem:[%s5243_s18 + $0x8] sm:$0xff] }
0x18aa   :  { %v3627_v12 = vsel %vm167_vm2, %v3625_v54, 0.0  ;;  %v3908_v54 = vld [vmem:[%s5243_s18] sm:$0xff] }
0x18ab   :  { %3628 = vadd.xlane.f32.xlu1 %v3627_v12 }
0x1932   :  { %v3632_v62 = vpop.xlane.xlu0 %3631 }
0x1933   :  { %v3634_v63 = vmul.f32 0.03125, %v3632_v62 }
0x1934   :  { %v3629_v0 = vpop.xlane.xlu1 %3628 }
0x1935   :  { %v3636_v1 = vadd.f32 1e-05, %v3634_v63  ;;  %v3633_v2 = vmul.f32 0.03125, %v3629_v0  ;;  %v4118_v63 = vld [vmem:[%s5245_s17] ss:$0 sm:$0xff] }
0x1937   :  { %4590 = vrsqrt.f32 %v3636_v1  ;;  %v3635_v3 = vadd.f32 1e-05, %v3633_v2 }
0x1939   :  { %4592 = vrsqrt.f32 %v3635_v3 }
0x1944   :  { %v4591_v4 = vpop.eup %4590 }
0x1945   :  { %v3640_v6 = vmul.f32 %v4591_v4, %v3624_v49  ;;  %v4000_v49 = vld [vmem:[%s5242_s3] sm:$0x3f] }
0x1946   :  { %v4593_v7 = vpop.eup %4592 }
0x1947   :  { %v3639_v8 = vmul.f32 %v4593_v7, %v3623_v51  ;;  %v3648_v9 = vmul.f32 %v4109_v5, %v3640_v6  ;;  %v3911_v51 = vld [vmem:[%s5243_s18 + $0x18] sm:$0xff] }
0x1948   :  { %4487 = vmatprep.subr.mxu1 %v3911_v51 }
0x1949   :  { %v3647_v13 = vmul.f32 %v4109_v5, %v3639_v8  ;;  %v3656_v15 = vadd.f32 %v4110_v10, %v3648_v9 }
0x194b   :  { %v3655_v14 = vadd.f32 %v4110_v10, %v3647_v13  ;;  %v4119_v10 = vld [vmem:[%s5246_s19] ss:$0 sm:$0xff] }
0x194d   :  { %4465 = vmatprep.mubr.msk.f32.mxu1 %vm167_vm2, %v3655_v14 }
0x194e   :  { %4466 = vmatmul.mubr.msk.f32.vlgmr.msra.gmra.mxu1 %vm167_vm2, %v3656_v15 }
0x194f   :  { %4488 = vmatpush3.msra.mxu1 %v3911_v51 }
0x1950   :  { %4489 = vmatprep.subr.mxu1 %v3910_v52 }
0x1951   :  { %4490 = vmatpush3.msra.mxu1 %v3910_v52 }
0x1952   :  { %4491 = vmatprep.subr.mxu1 %v3909_v53 }
0x1953   :  { %4492 = vmatpush3.msra.mxu1 %v3909_v53 }
0x1954   :  { %4493 = vmatprep.subr.mxu1 %v3908_v54 }
0x1955   :  { %4494 = vmatpush3.msra.mxu1 %v3908_v54 }
0x1a0e   :  { %v4467_v24 = vpop.f32.mrf.mxu1 }
0x1a0f   :  { %v3746_v26 = vadd.f32 %v4467_v24, %v4111_v23 }
0x1a10   :  { %v3740_v27 = vpop.f32.mrf.mxu1 }
0x1a11   :  { %v3741_v28 = vadd.f32 %v4111_v23, %v3740_v27  ;;  %v3750_v17 = vmax.f32 %v3746_v26, 0.0 }
0x1a13   :  { %v3749_v29 = vmax.f32 %v3741_v28, 0.0 }
0x1a15   :  { %4484 = vmatprep.mubr.msk.f32.mxu0 %vm3766_vm5, %v3749_v29 }
0x1a16   :  { %4485 = vmatmul.mubr.msk.f32.vlgmr.msra.gmra.mxu0 %vm3766_vm5, %v3750_v17 }
0x1ad6   :  { %v4486_v31 = vpop.f32.mrf.mxu0 }
0x1ad7   :  { %v3845_v32 = vadd.f32 %v4486_v31, %v4114_v30 }
0x1ad8   :  { %v3839_v21 = vpop.f32.mrf.mxu0 }
0x1ad9   :  { %v3840_v33 = vadd.f32 %v4114_v30, %v3839_v21  ;;  %v3849_v18 = vadd.f32 %v3845_v32, %v3656_v15 }
0x1adb   :  { %v3855_v34 = vsel %vm167_vm2, %v3849_v18, 0.0  ;;  %v3848_v35 = vadd.f32 %v3840_v33, %v3655_v14 }
0x1adc   :  { %3856 = vadd.xlane.f32.xlu0 %v3855_v34 }
0x1add   :  { %v3852_v38 = vsel %vm167_vm2, %v3848_v35, 0.0 }
0x1ade   :  { %3853 = vadd.xlane.f32.xlu1 %v3852_v38 }
0x1b65   :  { %v3857_v37 = vpop.xlane.xlu0 %3856 }
0x1b66   :  { %v3859_v39 = vmul.f32 0.03125, %v3857_v37 }
0x1b67   :  { %v3854_v40 = vpop.xlane.xlu1 %3853 }
0x1b68   :  { %v3861_v41 = vsub.f32 %v3849_v18, %v3859_v39  ;;  %v3858_v25 = vmul.f32 0.03125, %v3854_v40 }
0x1b6a   :  { %v3860_v42 = vsub.f32 %v3848_v35, %v3858_v25  ;;  %v3863_v43 = vmul.f32 %v3861_v41, %v3861_v41 }
0x1b6c   :  { %v3867_v44 = vsel %vm167_vm2, %v3863_v43, 0.0  ;;  %v3862_v45 = vmul.f32 %v3860_v42, %v3860_v42 }
0x1b6d   :  { %3868 = vadd.xlane.f32.xlu0 %v3867_v44 }
0x1b6e   :  { %v3864_v46 = vsel %vm167_vm2, %v3862_v45, 0.0 }
0x1b6f   :  { %3865 = vadd.xlane.f32.xlu1 %v3864_v46 }
0x1b80   :  { %3898 = vperm.xlu1 %4524, %v3894_v47  }
0x1b83   :  { %3903 = vperm.xlu0 %4525, %v3895_v48  }
0x1b84   :  { %4004 = vperm.xlu1 %4524, %v4000_v49  }
0x1b88   :  { %4009 = vperm.xlu1 %4524, %v4001_v50  }
0x1bf6   :  { %v3869_v12 = vpop.xlane.xlu0 %3868 }
0x1bf7   :  { %v3871_v11 = vmul.f32 0.03125, %v3869_v12 }
0x1bf8   :  { %v3866_v55 = vpop.xlane.xlu1 %3865 }
0x1bf9   :  { %v3873_v56 = vadd.f32 1e-05, %v3871_v11  ;;  %v3870_v57 = vmul.f32 0.03125, %v3866_v55 }
0x1bfb   :  { %4594 = vrsqrt.f32 %v3873_v56  ;;  %v3872_v58 = vadd.f32 1e-05, %v3870_v57 }
0x1bfc   :  { %v3899_v6 = vpop.permute.xlu1 %3898 }
0x1bfd   :  { %4596 = vrsqrt.f32 %v3872_v58 }
0x1bfe   :  { %v3904_v5 = vpop.permute.xlu0 %3903 }
0x1c00   :  { %v4005_v9 = vpop.permute.xlu1 %4004 }
0x1c04   :  { %v4010_v15 = vpop.permute.xlu1 %4009 }
0x1c08   :  { %v4595_v59 = vpop.eup %4594 }
0x1c09   :  { %v3877_v61 = vmul.f32 %v4595_v59, %v3861_v41 }
0x1c0a   :  { %v4597_v62 = vpop.eup %4596 }
0x1c0b   :  { %v3876_v0 = vmul.f32 %v4597_v62, %v3860_v42  ;;  %v3885_v1 = vmul.f32 %v4117_v60, %v3877_v61 }
0x1c0d   :  { %v3884_v2 = vmul.f32 %v4117_v60, %v3876_v0  ;;  %v3893_v3 = vadd.f32 %v4118_v63, %v3885_v1 }
0x1c0f   :  { %v3892_v4 = vadd.f32 %v4118_v63, %v3884_v2  ;;  %v3907_v8 = vmul.f32 %v3904_v5, %v3893_v3 }
0x1c11   :  { %v3906_v7 = vmul.f32 %v3899_v6, %v3892_v4 }
0x1c13   :  { %4495 = vmatprep.mubr.msk.f32.mxu1 %vm167_vm2, %v3906_v7 }
0x1c14   :  { %4496 = vmatmul.mubr.msk.f32.vlgmr.msra.gmra.mxu1 %vm167_vm2, %v3907_v8 }
0x1cd4   :  { %v4497_v13 = vpop.f32.mrf.mxu1 }
0x1cd5   :  { %v3997_v14 = vadd.f32 %v4497_v13, %v4119_v10 }
0x1cd6   :  { %v3991_v16 = vpop.f32.mrf.mxu1 }
0x1cd7   :  { %v4013_v19 = vmul.f32 %v4010_v15, %v3997_v14  ;;  %v3992_v20 = vadd.f32 %v4119_v10, %v3991_v16 }
0x1cd9   :  { %4016 = vst.msk [vmem:[%s5247_s20 + $0x8] sm:$0x3f] %vm4014_vm6, %v4013_v19  ;;  %v4012_v22 = vmul.f32 %v4005_v9, %v3992_v20 }
0x1cdb   :  { %4015 = vst.msk [vmem:[%s5247_s20] sm:$0x3f] %vm4014_vm6, %v4012_v22 }

</bundles_post_ra>
